<compile_context>
chip_gen: v6e
topology: v6e:2x2x1
jax: 0.10.0
libtpu: 0.0.40
codegen_flags: <defaults>
</compile_context>

<pallas_src>
import jax
import jax.numpy as jnp
from jax import lax
from jax.experimental import pallas as pl
from jax.experimental.pallas import tpu as pltpu


def _make_kernel(T, B, H):
    """Kernel factory; T, B, H are static Python ints (closure constants)."""
    H3 = 3 * H
    H4 = 4 * H

    def kernel(x_ref, mask_ref, wih_all_ref, b_all_ref, whh_blk_ref,
               fcw_f_ref, fcw_b_ref, fcb_ref, out_ref,
               gx_ref, hbuf_f, hbuf_b):
        # x_ref     : (T*B, H)   embedded inputs, row = t*B + b (time-major)
        # mask_ref  : (T*B, 1)   validity mask (1.0 valid / 0.0 pad)
        # wih_all   : (H, 8H)    [W_ih_fwd | W_ih_bwd], gate order i,f,o,g
        # b_all     : (1, 8H)    combined biases for both directions
        # whh_blk   : (2H, 8H)   block-diag [[W_hh_f, 0], [0, W_hh_b]]
        # fcw_f/b   : (H, O)     FC weight halves (pre-transposed)
        # fcb       : (1, O)     FC bias
        # out_ref   : (T*B, O)   logits
        # gx_ref    : (T*B, 8H)  scratch: hoisted input-projection gates
        # hbuf_f/b  : (T*B, H)   scratch: per-direction masked hidden outputs

        # ---- hoisted input projection: ONE big GEMM, bias folded in --------
        gx_ref[...] = (
            jnp.dot(x_ref[...], wih_all_ref[...],
                    preferred_element_type=jnp.float32)
            + b_all_ref[...]
        )

        whh_blk = whh_blk_ref[...]

        def update(gates, c):
            # gate order (i, f, o, g): one sigmoid over 3H, one tanh over H
            sg = jax.nn.sigmoid(gates[:, :H3])
            g = jnp.tanh(gates[:, H3:])
            c_new = sg[:, H:2 * H] * c + sg[:, :H] * g
            h_new = sg[:, 2 * H:H3] * jnp.tanh(c_new)
            return h_new, c_new

        # ---- merged fwd + bwd recurrence (two independent chains / iter) ---
        def step(i, carry):
            h_f, c_f, h_b, c_b = carry
            rf = i * B                    # forward timestep row offset
            rb = (T - 1 - i) * B          # backward timestep row offset

            # single 256-lane-wide recurrent matmul covering both directions
            h_cat = jnp.concatenate([h_f, h_b], axis=1)          # (B, 2H)
            gh = jnp.dot(h_cat, whh_blk,
                         preferred_element_type=jnp.float32)     # (B, 8H)

            gates_f = gx_ref[pl.ds(rf, B), :H4] + gh[:, :H4]
            gates_b = gx_ref[pl.ds(rb, B), H4:] + gh[:, H4:]

            hf_new, cf_new = update(gates_f, c_f)
            hb_new, cb_new = update(gates_b, c_b)

            mf = mask_ref[pl.ds(rf, B), :]                        # (B, 1)
            mb = mask_ref[pl.ds(rb, B), :]
            kf = mf > 0.0
            kb = mb > 0.0

            # freeze state at padded steps (packed-sequence semantics)
            hf_new = jnp.where(kf, hf_new, h_f)
            cf_new = jnp.where(kf, cf_new, c_f)
            hb_new = jnp.where(kb, hb_new, h_b)
            cb_new = jnp.where(kb, cb_new, c_b)

            # padded outputs are zero
            hbuf_f[pl.ds(rf, B), :] = hf_new * mf
            hbuf_b[pl.ds(rb, B), :] = hb_new * mb

            return hf_new, cf_new, hb_new, cb_new

        z = jnp.zeros((B, H), jnp.float32)
        lax.fori_loop(0, T, step, (z, z, z, z), unroll=True)

        # ---- FC as one lane-dense GEMM + a single output store -------------
        out_ref[...] = (
            jnp.dot(hbuf_f[...], fcw_f_ref[...],
                    preferred_element_type=jnp.float32)
            + jnp.dot(hbuf_b[...], fcw_b_ref[...],
                      preferred_element_type=jnp.float32)
            + fcb_ref[...]
        ).astype(out_ref.dtype)

    return kernel


def init_params(key, vocab_size, output_size, hidden_size):
    """Deterministic synthetic parameters, same shapes as the PyTorch module."""
    ks = jax.random.split(key, 12)
    H, O = hidden_size, output_size
    n = lambda k, s: (0.1 * jax.random.normal(k, s)).astype(jnp.float32)
    return {
        "embedding": n(ks[0], (vocab_size, H)),
        # forward direction
        "w_ih_f": n(ks[1], (4 * H, H)),
        "w_hh_f": n(ks[2], (4 * H, H)),
        "b_ih_f": n(ks[3], (4 * H,)),
        "b_hh_f": n(ks[4], (4 * H,)),
        # backward direction
        "w_ih_b": n(ks[5], (4 * H, H)),
        "w_hh_b": n(ks[6], (4 * H, H)),
        "b_ih_b": n(ks[7], (4 * H,)),
        "b_hh_b": n(ks[8], (4 * H,)),
        # fc
        "fc_w": n(ks[9], (O, 2 * H)),
        "fc_b": n(ks[10], (O,)),
    }


def _reorder_ifog(w):
    """Reorder last-axis gate blocks from PyTorch (i,f,g,o) to (i,f,o,g)."""
    i, f, g, o = jnp.split(w, 4, axis=-1)
    return jnp.concatenate([i, f, o, g], axis=-1)


def lstm_softmax_forward(seq_tensor, mask, params):
    """seq_tensor: (B, T) int32 token ids; mask: (B, T) {0,1}. Returns (B, T, O)."""
    emb = params["embedding"]
    B, T = seq_tensor.shape
    H = emb.shape[1]
    O = params["fc_w"].shape[0]

    # glue in plain JAX: embedding gather + time-major 2-D layout (row = t*B+b)
    x = emb[seq_tensor.T].reshape(T * B, H).astype(jnp.float32)
    mask_2d = mask.T.astype(jnp.float32).reshape(T * B, 1)

    # weight prep: transpose, reorder gates to (i,f,o,g), fold b_ih+b_hh
    wih_f = _reorder_ifog(params["w_ih_f"].T)                    # (H, 4H)
    wih_b = _reorder_ifog(params["w_ih_b"].T)
    whh_f = _reorder_ifog(params["w_hh_f"].T)
    whh_b = _reorder_ifog(params["w_hh_b"].T)
    b_f = _reorder_ifog((params["b_ih_f"] + params["b_hh_f"]).reshape(1, 4 * H))
    b_b = _reorder_ifog((params["b_ih_b"] + params["b_hh_b"]).reshape(1, 4 * H))

    wih_all = jnp.concatenate([wih_f, wih_b], axis=1)            # (H, 8H)
    b_all = jnp.concatenate([b_f, b_b], axis=1)                  # (1, 8H)
    zeros = jnp.zeros((H, 4 * H), jnp.float32)
    whh_blk = jnp.concatenate(                                   # (2H, 8H)
        [jnp.concatenate([whh_f, zeros], axis=1),
         jnp.concatenate([zeros, whh_b], axis=1)], axis=0)

    fcw = params["fc_w"].T                                       # (2H, O)
    fcw_f = fcw[:H]
    fcw_b = fcw[H:]
    fcb = params["fc_b"].reshape(1, O)

    kernel = _make_kernel(T, B, H)
    out_2d = pl.pallas_call(
        kernel,
        out_shape=jax.ShapeDtypeStruct((T * B, O), jnp.float32),
        scratch_shapes=[
            pltpu.VMEM((T * B, 8 * H), jnp.float32),   # hoisted input gates
            pltpu.VMEM((T * B, H), jnp.float32),       # fwd hidden outputs
            pltpu.VMEM((T * B, H), jnp.float32),       # bwd hidden outputs
        ],
    )(x, mask_2d, wih_all, b_all, whh_blk, fcw_f, fcw_b, fcb)

    # dropout is identity in eval mode; match logits.view(T,B,O).transpose(0,1)
    return out_2d.reshape(T, B, O).transpose(1, 0, 2)            # (B, T, O)


def reference_forward(seq_tensor, mask, params):
    """Pure-JAX reference mirroring packed bidirectional LSTM + FC."""
    emb = params["embedding"]
    B, T = seq_tensor.shape
    H = emb.shape[1]
    x = emb[seq_tensor.T]                                   # (T, B, H)
    m = mask.T.astype(jnp.float32)[:, :, None]              # (T, B, 1)

    def run(wih, whh, b_ih, b_hh, reverse):
        h = jnp.zeros((B, H), jnp.float32)
        c = jnp.zeros((B, H), jnp.float32)
        outs = [None] * T
        ts = range(T - 1, -1, -1) if reverse else range(T)
        for t in ts:
            gates = x[t] @ wih.T + h @ whh.T + b_ih + b_hh
            i = jax.nn.sigmoid(gates[:, :H])
            f = jax.nn.sigmoid(gates[:, H:2 * H])
            g = jnp.tanh(gates[:, 2 * H:3 * H])
            o = jax.nn.sigmoid(gates[:, 3 * H:])
            c_new = f * c + i * g
            h_new = o * jnp.tanh(c_new)
            h = jnp.where(m[t] > 0, h_new, h)
            c = jnp.where(m[t] > 0, c_new, c)
            outs[t] = h * m[t]
        return jnp.stack(outs)                              # (T, B, H)

    hf = run(params["w_ih_f"], params["w_hh_f"], params["b_ih_f"], params["b_hh_f"], False)
    hb = run(params["w_ih_b"], params["w_hh_b"], params["b_ih_b"], params["b_hh_b"], True)
    out = jnp.concatenate([hf, hb], axis=-1)                # (T, B, 2H)
    logits = out.reshape(T * B, 2 * H) @ params["fc_w"].T + params["fc_b"]
    return logits.reshape(T, B, -1).transpose(1, 0, 2)      # (B, T, O)


if __name__ == "__main__":
    vocab_size = 50
    output_size = 8
    hidden_size = 32
    batch = 2
    seq_len = 8

    key = jax.random.PRNGKey(0)
    kp, kd = jax.random.split(key)
    params = init_params(kp, vocab_size, output_size, hidden_size)

    # token ids and mask (lengths sorted descending, as pack_padded_sequence requires)
    seq_tensor = jax.random.randint(kd, (batch, seq_len), 0, vocab_size, dtype=jnp.int32)
    lengths = jnp.array([8, 6], dtype=jnp.int32)
    mask = (jnp.arange(seq_len)[None, :] < lengths[:, None]).astype(jnp.int32)  # (B, T)

    logits = lstm_softmax_forward(seq_tensor, mask, params)
    logits = jax.block_until_ready(logits)

    ref = reference_forward(seq_tensor, mask, params)
    assert logits.shape == (batch, seq_len, output_size)
    assert jnp.allclose(logits, ref, atol=1e-5, rtol=1e-5), "mismatch vs reference"

    print("KERNEL_OK")
</pallas_src>

<mosaic_0001>
module attributes {stable_mosaic.version = 11 : i64} {
  func.func @kernel(%arg0: memref<16x32xf32, #tpu.memory_space<vmem>>, %arg1: memref<16x1xf32, #tpu.memory_space<vmem>>, %arg2: memref<32x256xf32, #tpu.memory_space<vmem>>, %arg3: memref<1x256xf32, #tpu.memory_space<vmem>>, %arg4: memref<64x256xf32, #tpu.memory_space<vmem>>, %arg5: memref<32x8xf32, #tpu.memory_space<vmem>>, %arg6: memref<32x8xf32, #tpu.memory_space<vmem>>, %arg7: memref<1x8xf32, #tpu.memory_space<vmem>>, %arg8: memref<16x8xf32, #tpu.memory_space<vmem>>, %arg9: memref<16x256xf32, #tpu.memory_space<vmem>>, %arg10: memref<16x32xf32, #tpu.memory_space<vmem>>, %arg11: memref<16x32xf32, #tpu.memory_space<vmem>>) attributes {dimension_semantics = [], scalar_prefetch = 0 : i64, scratch_operands = 3 : i64, tpu.core_type = #tpu.core_type<tc>} {
    %c0 = arith.constant 0 : index
    %c0_0 = arith.constant 0 : index
    %0 = vector.load %arg0[%c0, %c0_0] : memref<16x32xf32, #tpu.memory_space<vmem>>, vector<16x32xf32>
    %c0_1 = arith.constant 0 : index
    %c0_2 = arith.constant 0 : index
    %1 = vector.load %arg2[%c0_1, %c0_2] : memref<32x256xf32, #tpu.memory_space<vmem>>, vector<32x256xf32>
    %cst = arith.constant dense<0.000000e+00> : vector<16x256xf32>
    %2 = tpu.matmul %0, %1, %cst {dimension_numbers = #tpu.dot_dimension_numbers<[1], [0], [0], [1], [0, 0, 1, 1], [], []>} : vector<16x32xf32>, vector<32x256xf32>, vector<16x256xf32> -> vector<16x256xf32>
    %c0_3 = arith.constant 0 : index
    %c0_4 = arith.constant 0 : index
    %3 = vector.load %arg3[%c0_3, %c0_4] : memref<1x256xf32, #tpu.memory_space<vmem>>, vector<1x256xf32>
    %4 = vector.broadcast %3 : vector<1x256xf32> to vector<16x256xf32>
    %5 = arith.addf %2, %4 : vector<16x256xf32>
    %c0_5 = arith.constant 0 : index
    %c0_6 = arith.constant 0 : index
    %6 = vector.load %arg9[%c0_5, %c0_6] : memref<16x256xf32, #tpu.memory_space<vmem>>, vector<16x256xf32>
    tpu.vector_store %arg9[%c0_5, %c0_6], %5 {strides = array<i32>} : memref<16x256xf32, #tpu.memory_space<vmem>>, vector<16x256xf32>,
    %c0_7 = arith.constant 0 : index
    %c0_8 = arith.constant 0 : index
    %7 = vector.load %arg4[%c0_7, %c0_8] : memref<64x256xf32, #tpu.memory_space<vmem>>, vector<64x256xf32>
    %cst_9 = arith.constant 0.000000e+00 : f32
    %8 = vector.broadcast %cst_9 : f32 to vector<2x32xf32>
    %c0_i32 = arith.constant 0 : i32
    %c2_i32 = arith.constant 2 : i32
    %9 = arith.muli %c0_i32, %c2_i32 : i32
    %c7_i32 = arith.constant 7 : i32
    %10 = arith.subi %c7_i32, %c0_i32 : i32
    %c2_i32_10 = arith.constant 2 : i32
    %11 = arith.muli %10, %c2_i32_10 : i32
    %12 = tpu.concatenate %8, %8 in 1 : vector<2x32xf32>, vector<2x32xf32> -> vector<2x64xf32>
    %cst_11 = arith.constant dense<0.000000e+00> : vector<2x256xf32>
    %13 = tpu.matmul %12, %7, %cst_11 {dimension_numbers = #tpu.dot_dimension_numbers<[1], [0], [0], [1], [0, 0, 1, 1], [], []>} : vector<2x64xf32>, vector<64x256xf32>, vector<2x256xf32> -> vector<2x256xf32>
    %14 = arith.index_cast %9 : i32 to index
    %c0_12 = arith.constant 0 : index
    %15 = vector.load %arg9[%14, %c0_12] : memref<16x256xf32, #tpu.memory_space<vmem>>, vector<2x128xf32>
    %16 = vector.extract_strided_slice %13 {offsets = [0, 0], sizes = [2, 128], strides = [1, 1]} : vector<2x256xf32> to vector<2x128xf32>
    %17 = arith.addf %15, %16 : vector<2x128xf32>
    %18 = arith.index_cast %11 : i32 to index
    %c128 = arith.constant 128 : index
    %19 = vector.load %arg9[%18, %c128] : memref<16x256xf32, #tpu.memory_space<vmem>>, vector<2x128xf32>
    %20 = vector.extract_strided_slice %13 {offsets = [0, 128], sizes = [2, 128], strides = [1, 1]} : vector<2x256xf32> to vector<2x128xf32>
    %21 = arith.addf %19, %20 : vector<2x128xf32>
    %22 = vector.extract_strided_slice %17 {offsets = [0, 0], sizes = [2, 96], strides = [1, 1]} : vector<2x128xf32> to vector<2x96xf32>
    %23 = arith.negf %22 : vector<2x96xf32>
    %24 = math.exp %23 : vector<2x96xf32>
    %cst_13 = arith.constant 1.000000e+00 : f32
    %25 = vector.broadcast %cst_13 : f32 to vector<2x96xf32>
    %26 = arith.addf %25, %24 : vector<2x96xf32>
    %27 = arith.divf %25, %26 : vector<2x96xf32>
    %28 = vector.extract_strided_slice %17 {offsets = [0, 96], sizes = [2, 32], strides = [1, 1]} : vector<2x128xf32> to vector<2x32xf32>
    %29 = math.tanh %28 : vector<2x32xf32>
    %30 = vector.extract_strided_slice %27 {offsets = [0, 32], sizes = [2, 32], strides = [1, 1]} : vector<2x96xf32> to vector<2x32xf32>
    %31 = arith.mulf %30, %8 : vector<2x32xf32>
    %32 = vector.extract_strided_slice %27 {offsets = [0, 0], sizes = [2, 32], strides = [1, 1]} : vector<2x96xf32> to vector<2x32xf32>
    %33 = arith.mulf %32, %29 : vector<2x32xf32>
    %34 = arith.addf %31, %33 : vector<2x32xf32>
    %35 = vector.extract_strided_slice %27 {offsets = [0, 64], sizes = [2, 32], strides = [1, 1]} : vector<2x96xf32> to vector<2x32xf32>
    %36 = math.tanh %34 : vector<2x32xf32>
    %37 = arith.mulf %35, %36 : vector<2x32xf32>
    %38 = vector.extract_strided_slice %21 {offsets = [0, 0], sizes = [2, 96], strides = [1, 1]} : vector<2x128xf32> to vector<2x96xf32>
    %39 = arith.negf %38 : vector<2x96xf32>
    %40 = math.exp %39 : vector<2x96xf32>
    %cst_14 = arith.constant 1.000000e+00 : f32
    %41 = vector.broadcast %cst_14 : f32 to vector<2x96xf32>
    %42 = arith.addf %41, %40 : vector<2x96xf32>
    %43 = arith.divf %41, %42 : vector<2x96xf32>
    %44 = vector.extract_strided_slice %21 {offsets = [0, 96], sizes = [2, 32], strides = [1, 1]} : vector<2x128xf32> to vector<2x32xf32>
    %45 = math.tanh %44 : vector<2x32xf32>
    %46 = vector.extract_strided_slice %43 {offsets = [0, 32], sizes = [2, 32], strides = [1, 1]} : vector<2x96xf32> to vector<2x32xf32>
    %47 = arith.mulf %46, %8 : vector<2x32xf32>
    %48 = vector.extract_strided_slice %43 {offsets = [0, 0], sizes = [2, 32], strides = [1, 1]} : vector<2x96xf32> to vector<2x32xf32>
    %49 = arith.mulf %48, %45 : vector<2x32xf32>
    %50 = arith.addf %47, %49 : vector<2x32xf32>
    %51 = vector.extract_strided_slice %43 {offsets = [0, 64], sizes = [2, 32], strides = [1, 1]} : vector<2x96xf32> to vector<2x32xf32>
    %52 = math.tanh %50 : vector<2x32xf32>
    %53 = arith.mulf %51, %52 : vector<2x32xf32>
    %54 = arith.index_cast %9 : i32 to index
    %c0_15 = arith.constant 0 : index
    %55 = vector.load %arg1[%54, %c0_15] : memref<16x1xf32, #tpu.memory_space<vmem>>, vector<2x1xf32>
    %56 = arith.index_cast %11 : i32 to index
    %c0_16 = arith.constant 0 : index
    %57 = vector.load %arg1[%56, %c0_16] : memref<16x1xf32, #tpu.memory_space<vmem>>, vector<2x1xf32>
    %cst_17 = arith.constant 0.000000e+00 : f32
    %58 = vector.broadcast %cst_17 : f32 to vector<2x1xf32>
    %59 = arith.cmpf ogt, %55, %58 : vector<2x1xf32>
    %cst_18 = arith.constant 0.000000e+00 : f32
    %60 = vector.broadcast %cst_18 : f32 to vector<2x1xf32>
    %61 = arith.cmpf ogt, %57, %60 : vector<2x1xf32>
    %62 = vector.shape_cast %59 : vector<2x1xi1> to vector<2x1xi1>
    %63 = vector.broadcast %62 : vector<2x1xi1> to vector<2x32xi1>
    %64 = arith.select %63, %37, %8 : vector<2x32xi1>, vector<2x32xf32>
    %65 = vector.shape_cast %59 : vector<2x1xi1> to vector<2x1xi1>
    %66 = vector.broadcast %65 : vector<2x1xi1> to vector<2x32xi1>
    %67 = arith.select %66, %34, %8 : vector<2x32xi1>, vector<2x32xf32>
    %68 = vector.shape_cast %61 : vector<2x1xi1> to vector<2x1xi1>
    %69 = vector.broadcast %68 : vector<2x1xi1> to vector<2x32xi1>
    %70 = arith.select %69, %53, %8 : vector<2x32xi1>, vector<2x32xf32>
    %71 = vector.shape_cast %61 : vector<2x1xi1> to vector<2x1xi1>
    %72 = vector.broadcast %71 : vector<2x1xi1> to vector<2x32xi1>
    %73 = arith.select %72, %50, %8 : vector<2x32xi1>, vector<2x32xf32>
    %74 = vector.broadcast %55 : vector<2x1xf32> to vector<2x32xf32>
    %75 = arith.mulf %64, %74 : vector<2x32xf32>
    %76 = arith.index_cast %9 : i32 to index
    %c0_19 = arith.constant 0 : index
    %77 = vector.load %arg10[%76, %c0_19] : memref<16x32xf32, #tpu.memory_space<vmem>>, vector<2x32xf32>
    tpu.vector_store %arg10[%76, %c0_19], %75 {strides = array<i32>} : memref<16x32xf32, #tpu.memory_space<vmem>>, vector<2x32xf32>,
    %78 = vector.broadcast %57 : vector<2x1xf32> to vector<2x32xf32>
    %79 = arith.mulf %70, %78 : vector<2x32xf32>
    %80 = arith.index_cast %11 : i32 to index
    %c0_20 = arith.constant 0 : index
    %81 = vector.load %arg11[%80, %c0_20] : memref<16x32xf32, #tpu.memory_space<vmem>>, vector<2x32xf32>
    tpu.vector_store %arg11[%80, %c0_20], %79 {strides = array<i32>} : memref<16x32xf32, #tpu.memory_space<vmem>>, vector<2x32xf32>,
    %c1_i32 = arith.constant 1 : i32
    %c2_i32_21 = arith.constant 2 : i32
    %82 = arith.muli %c1_i32, %c2_i32_21 : i32
    %c7_i32_22 = arith.constant 7 : i32
    %83 = arith.subi %c7_i32_22, %c1_i32 : i32
    %c2_i32_23 = arith.constant 2 : i32
    %84 = arith.muli %83, %c2_i32_23 : i32
    %85 = tpu.concatenate %64, %70 in 1 : vector<2x32xf32>, vector<2x32xf32> -> vector<2x64xf32>
    %cst_24 = arith.constant dense<0.000000e+00> : vector<2x256xf32>
    %86 = tpu.matmul %85, %7, %cst_24 {dimension_numbers = #tpu.dot_dimension_numbers<[1], [0], [0], [1], [0, 0, 1, 1], [], []>} : vector<2x64xf32>, vector<64x256xf32>, vector<2x256xf32> -> vector<2x256xf32>
    %87 = arith.index_cast %82 : i32 to index
    %c0_25 = arith.constant 0 : index
    %88 = vector.load %arg9[%87, %c0_25] : memref<16x256xf32, #tpu.memory_space<vmem>>, vector<2x128xf32>
    %89 = vector.extract_strided_slice %86 {offsets = [0, 0], sizes = [2, 128], strides = [1, 1]} : vector<2x256xf32> to vector<2x128xf32>
    %90 = arith.addf %88, %89 : vector<2x128xf32>
    %91 = arith.index_cast %84 : i32 to index
    %c128_26 = arith.constant 128 : index
    %92 = vector.load %arg9[%91, %c128_26] : memref<16x256xf32, #tpu.memory_space<vmem>>, vector<2x128xf32>
    %93 = vector.extract_strided_slice %86 {offsets = [0, 128], sizes = [2, 128], strides = [1, 1]} : vector<2x256xf32> to vector<2x128xf32>
    %94 = arith.addf %92, %93 : vector<2x128xf32>
    %95 = vector.extract_strided_slice %90 {offsets = [0, 0], sizes = [2, 96], strides = [1, 1]} : vector<2x128xf32> to vector<2x96xf32>
    %96 = arith.negf %95 : vector<2x96xf32>
    %97 = math.exp %96 : vector<2x96xf32>
    %cst_27 = arith.constant 1.000000e+00 : f32
    %98 = vector.broadcast %cst_27 : f32 to vector<2x96xf32>
    %99 = arith.addf %98, %97 : vector<2x96xf32>
    %100 = arith.divf %98, %99 : vector<2x96xf32>
    %101 = vector.extract_strided_slice %90 {offsets = [0, 96], sizes = [2, 32], strides = [1, 1]} : vector<2x128xf32> to vector<2x32xf32>
    %102 = math.tanh %101 : vector<2x32xf32>
    %103 = vector.extract_strided_slice %100 {offsets = [0, 32], sizes = [2, 32], strides = [1, 1]} : vector<2x96xf32> to vector<2x32xf32>
    %104 = arith.mulf %103, %67 : vector<2x32xf32>
    %105 = vector.extract_strided_slice %100 {offsets = [0, 0], sizes = [2, 32], strides = [1, 1]} : vector<2x96xf32> to vector<2x32xf32>
    %106 = arith.mulf %105, %102 : vector<2x32xf32>
    %107 = arith.addf %104, %106 : vector<2x32xf32>
    %108 = vector.extract_strided_slice %100 {offsets = [0, 64], sizes = [2, 32], strides = [1, 1]} : vector<2x96xf32> to vector<2x32xf32>
    %109 = math.tanh %107 : vector<2x32xf32>
    %110 = arith.mulf %108, %109 : vector<2x32xf32>
    %111 = vector.extract_strided_slice %94 {offsets = [0, 0], sizes = [2, 96], strides = [1, 1]} : vector<2x128xf32> to vector<2x96xf32>
    %112 = arith.negf %111 : vector<2x96xf32>
    %113 = math.exp %112 : vector<2x96xf32>
    %cst_28 = arith.constant 1.000000e+00 : f32
    %114 = vector.broadcast %cst_28 : f32 to vector<2x96xf32>
    %115 = arith.addf %114, %113 : vector<2x96xf32>
    %116 = arith.divf %114, %115 : vector<2x96xf32>
    %117 = vector.extract_strided_slice %94 {offsets = [0, 96], sizes = [2, 32], strides = [1, 1]} : vector<2x128xf32> to vector<2x32xf32>
    %118 = math.tanh %117 : vector<2x32xf32>
    %119 = vector.extract_strided_slice %116 {offsets = [0, 32], sizes = [2, 32], strides = [1, 1]} : vector<2x96xf32> to vector<2x32xf32>
    %120 = arith.mulf %119, %73 : vector<2x32xf32>
    %121 = vector.extract_strided_slice %116 {offsets = [0, 0], sizes = [2, 32], strides = [1, 1]} : vector<2x96xf32> to vector<2x32xf32>
    %122 = arith.mulf %121, %118 : vector<2x32xf32>
    %123 = arith.addf %120, %122 : vector<2x32xf32>
    %124 = vector.extract_strided_slice %116 {offsets = [0, 64], sizes = [2, 32], strides = [1, 1]} : vector<2x96xf32> to vector<2x32xf32>
    %125 = math.tanh %123 : vector<2x32xf32>
    %126 = arith.mulf %124, %125 : vector<2x32xf32>
    %127 = arith.index_cast %82 : i32 to index
    %c0_29 = arith.constant 0 : index
    %128 = vector.load %arg1[%127, %c0_29] : memref<16x1xf32, #tpu.memory_space<vmem>>, vector<2x1xf32>
    %129 = arith.index_cast %84 : i32 to index
    %c0_30 = arith.constant 0 : index
    %130 = vector.load %arg1[%129, %c0_30] : memref<16x1xf32, #tpu.memory_space<vmem>>, vector<2x1xf32>
    %cst_31 = arith.constant 0.000000e+00 : f32
    %131 = vector.broadcast %cst_31 : f32 to vector<2x1xf32>
    %132 = arith.cmpf ogt, %128, %131 : vector<2x1xf32>
    %cst_32 = arith.constant 0.000000e+00 : f32
    %133 = vector.broadcast %cst_32 : f32 to vector<2x1xf32>
    %134 = arith.cmpf ogt, %130, %133 : vector<2x1xf32>
    %135 = vector.shape_cast %132 : vector<2x1xi1> to vector<2x1xi1>
    %136 = vector.broadcast %135 : vector<2x1xi1> to vector<2x32xi1>
    %137 = arith.select %136, %110, %64 : vector<2x32xi1>, vector<2x32xf32>
    %138 = vector.shape_cast %132 : vector<2x1xi1> to vector<2x1xi1>
    %139 = vector.broadcast %138 : vector<2x1xi1> to vector<2x32xi1>
    %140 = arith.select %139, %107, %67 : vector<2x32xi1>, vector<2x32xf32>
    %141 = vector.shape_cast %134 : vector<2x1xi1> to vector<2x1xi1>
    %142 = vector.broadcast %141 : vector<2x1xi1> to vector<2x32xi1>
    %143 = arith.select %142, %126, %70 : vector<2x32xi1>, vector<2x32xf32>
    %144 = vector.shape_cast %134 : vector<2x1xi1> to vector<2x1xi1>
    %145 = vector.broadcast %144 : vector<2x1xi1> to vector<2x32xi1>
    %146 = arith.select %145, %123, %73 : vector<2x32xi1>, vector<2x32xf32>
    %147 = vector.broadcast %128 : vector<2x1xf32> to vector<2x32xf32>
    %148 = arith.mulf %137, %147 : vector<2x32xf32>
    %149 = arith.index_cast %82 : i32 to index
    %c0_33 = arith.constant 0 : index
    %150 = vector.load %arg10[%149, %c0_33] : memref<16x32xf32, #tpu.memory_space<vmem>>, vector<2x32xf32>
    tpu.vector_store %arg10[%149, %c0_33], %148 {strides = array<i32>} : memref<16x32xf32, #tpu.memory_space<vmem>>, vector<2x32xf32>,
    %151 = vector.broadcast %130 : vector<2x1xf32> to vector<2x32xf32>
    %152 = arith.mulf %143, %151 : vector<2x32xf32>
    %153 = arith.index_cast %84 : i32 to index
    %c0_34 = arith.constant 0 : index
    %154 = vector.load %arg11[%153, %c0_34] : memref<16x32xf32, #tpu.memory_space<vmem>>, vector<2x32xf32>
    tpu.vector_store %arg11[%153, %c0_34], %152 {strides = array<i32>} : memref<16x32xf32, #tpu.memory_space<vmem>>, vector<2x32xf32>,
    %c2_i32_35 = arith.constant 2 : i32
    %c2_i32_36 = arith.constant 2 : i32
    %155 = arith.muli %c2_i32_35, %c2_i32_36 : i32
    %c7_i32_37 = arith.constant 7 : i32
    %156 = arith.subi %c7_i32_37, %c2_i32_35 : i32
    %c2_i32_38 = arith.constant 2 : i32
    %157 = arith.muli %156, %c2_i32_38 : i32
    %158 = tpu.concatenate %137, %143 in 1 : vector<2x32xf32>, vector<2x32xf32> -> vector<2x64xf32>
    %cst_39 = arith.constant dense<0.000000e+00> : vector<2x256xf32>
    %159 = tpu.matmul %158, %7, %cst_39 {dimension_numbers = #tpu.dot_dimension_numbers<[1], [0], [0], [1], [0, 0, 1, 1], [], []>} : vector<2x64xf32>, vector<64x256xf32>, vector<2x256xf32> -> vector<2x256xf32>
    %160 = arith.index_cast %155 : i32 to index
    %c0_40 = arith.constant 0 : index
    %161 = vector.load %arg9[%160, %c0_40] : memref<16x256xf32, #tpu.memory_space<vmem>>, vector<2x128xf32>
    %162 = vector.extract_strided_slice %159 {offsets = [0, 0], sizes = [2, 128], strides = [1, 1]} : vector<2x256xf32> to vector<2x128xf32>
    %163 = arith.addf %161, %162 : vector<2x128xf32>
    %164 = arith.index_cast %157 : i32 to index
    %c128_41 = arith.constant 128 : index
    %165 = vector.load %arg9[%164, %c128_41] : memref<16x256xf32, #tpu.memory_space<vmem>>, vector<2x128xf32>
    %166 = vector.extract_strided_slice %159 {offsets = [0, 128], sizes = [2, 128], strides = [1, 1]} : vector<2x256xf32> to vector<2x128xf32>
    %167 = arith.addf %165, %166 : vector<2x128xf32>
    %168 = vector.extract_strided_slice %163 {offsets = [0, 0], sizes = [2, 96], strides = [1, 1]} : vector<2x128xf32> to vector<2x96xf32>
    %169 = arith.negf %168 : vector<2x96xf32>
    %170 = math.exp %169 : vector<2x96xf32>
    %cst_42 = arith.constant 1.000000e+00 : f32
    %171 = vector.broadcast %cst_42 : f32 to vector<2x96xf32>
    %172 = arith.addf %171, %170 : vector<2x96xf32>
    %173 = arith.divf %171, %172 : vector<2x96xf32>
    %174 = vector.extract_strided_slice %163 {offsets = [0, 96], sizes = [2, 32], strides = [1, 1]} : vector<2x128xf32> to vector<2x32xf32>
    %175 = math.tanh %174 : vector<2x32xf32>
    %176 = vector.extract_strided_slice %173 {offsets = [0, 32], sizes = [2, 32], strides = [1, 1]} : vector<2x96xf32> to vector<2x32xf32>
    %177 = arith.mulf %176, %140 : vector<2x32xf32>
    %178 = vector.extract_strided_slice %173 {offsets = [0, 0], sizes = [2, 32], strides = [1, 1]} : vector<2x96xf32> to vector<2x32xf32>
    %179 = arith.mulf %178, %175 : vector<2x32xf32>
    %180 = arith.addf %177, %179 : vector<2x32xf32>
    %181 = vector.extract_strided_slice %173 {offsets = [0, 64], sizes = [2, 32], strides = [1, 1]} : vector<2x96xf32> to vector<2x32xf32>
    %182 = math.tanh %180 : vector<2x32xf32>
    %183 = arith.mulf %181, %182 : vector<2x32xf32>
    %184 = vector.extract_strided_slice %167 {offsets = [0, 0], sizes = [2, 96], strides = [1, 1]} : vector<2x128xf32> to vector<2x96xf32>
    %185 = arith.negf %184 : vector<2x96xf32>
    %186 = math.exp %185 : vector<2x96xf32>
    %cst_43 = arith.constant 1.000000e+00 : f32
    %187 = vector.broadcast %cst_43 : f32 to vector<2x96xf32>
    %188 = arith.addf %187, %186 : vector<2x96xf32>
    %189 = arith.divf %187, %188 : vector<2x96xf32>
    %190 = vector.extract_strided_slice %167 {offsets = [0, 96], sizes = [2, 32], strides = [1, 1]} : vector<2x128xf32> to vector<2x32xf32>
    %191 = math.tanh %190 : vector<2x32xf32>
    %192 = vector.extract_strided_slice %189 {offsets = [0, 32], sizes = [2, 32], strides = [1, 1]} : vector<2x96xf32> to vector<2x32xf32>
    %193 = arith.mulf %192, %146 : vector<2x32xf32>
    %194 = vector.extract_strided_slice %189 {offsets = [0, 0], sizes = [2, 32], strides = [1, 1]} : vector<2x96xf32> to vector<2x32xf32>
    %195 = arith.mulf %194, %191 : vector<2x32xf32>
    %196 = arith.addf %193, %195 : vector<2x32xf32>
    %197 = vector.extract_strided_slice %189 {offsets = [0, 64], sizes = [2, 32], strides = [1, 1]} : vector<2x96xf32> to vector<2x32xf32>
    %198 = math.tanh %196 : vector<2x32xf32>
    %199 = arith.mulf %197, %198 : vector<2x32xf32>
    %200 = arith.index_cast %155 : i32 to index
    %c0_44 = arith.constant 0 : index
    %201 = vector.load %arg1[%200, %c0_44] : memref<16x1xf32, #tpu.memory_space<vmem>>, vector<2x1xf32>
    %202 = arith.index_cast %157 : i32 to index
    %c0_45 = arith.constant 0 : index
    %203 = vector.load %arg1[%202, %c0_45] : memref<16x1xf32, #tpu.memory_space<vmem>>, vector<2x1xf32>
    %cst_46 = arith.constant 0.000000e+00 : f32
    %204 = vector.broadcast %cst_46 : f32 to vector<2x1xf32>
    %205 = arith.cmpf ogt, %201, %204 : vector<2x1xf32>
    %cst_47 = arith.constant 0.000000e+00 : f32
    %206 = vector.broadcast %cst_47 : f32 to vector<2x1xf32>
    %207 = arith.cmpf ogt, %203, %206 : vector<2x1xf32>
    %208 = vector.shape_cast %205 : vector<2x1xi1> to vector<2x1xi1>
    %209 = vector.broadcast %208 : vector<2x1xi1> to vector<2x32xi1>
    %210 = arith.select %209, %183, %137 : vector<2x32xi1>, vector<2x32xf32>
    %211 = vector.shape_cast %205 : vector<2x1xi1> to vector<2x1xi1>
    %212 = vector.broadcast %211 : vector<2x1xi1> to vector<2x32xi1>
    %213 = arith.select %212, %180, %140 : vector<2x32xi1>, vector<2x32xf32>
    %214 = vector.shape_cast %207 : vector<2x1xi1> to vector<2x1xi1>
    %215 = vector.broadcast %214 : vector<2x1xi1> to vector<2x32xi1>
    %216 = arith.select %215, %199, %143 : vector<2x32xi1>, vector<2x32xf32>
    %217 = vector.shape_cast %207 : vector<2x1xi1> to vector<2x1xi1>
    %218 = vector.broadcast %217 : vector<2x1xi1> to vector<2x32xi1>
    %219 = arith.select %218, %196, %146 : vector<2x32xi1>, vector<2x32xf32>
    %220 = vector.broadcast %201 : vector<2x1xf32> to vector<2x32xf32>
    %221 = arith.mulf %210, %220 : vector<2x32xf32>
    %222 = arith.index_cast %155 : i32 to index
    %c0_48 = arith.constant 0 : index
    %223 = vector.load %arg10[%222, %c0_48] : memref<16x32xf32, #tpu.memory_space<vmem>>, vector<2x32xf32>
    tpu.vector_store %arg10[%222, %c0_48], %221 {strides = array<i32>} : memref<16x32xf32, #tpu.memory_space<vmem>>, vector<2x32xf32>,
    %224 = vector.broadcast %203 : vector<2x1xf32> to vector<2x32xf32>
    %225 = arith.mulf %216, %224 : vector<2x32xf32>
    %226 = arith.index_cast %157 : i32 to index
    %c0_49 = arith.constant 0 : index
    %227 = vector.load %arg11[%226, %c0_49] : memref<16x32xf32, #tpu.memory_space<vmem>>, vector<2x32xf32>
    tpu.vector_store %arg11[%226, %c0_49], %225 {strides = array<i32>} : memref<16x32xf32, #tpu.memory_space<vmem>>, vector<2x32xf32>,
    %c3_i32 = arith.constant 3 : i32
    %c2_i32_50 = arith.constant 2 : i32
    %228 = arith.muli %c3_i32, %c2_i32_50 : i32
    %c7_i32_51 = arith.constant 7 : i32
    %229 = arith.subi %c7_i32_51, %c3_i32 : i32
    %c2_i32_52 = arith.constant 2 : i32
    %230 = arith.muli %229, %c2_i32_52 : i32
    %231 = tpu.concatenate %210, %216 in 1 : vector<2x32xf32>, vector<2x32xf32> -> vector<2x64xf32>
    %cst_53 = arith.constant dense<0.000000e+00> : vector<2x256xf32>
    %232 = tpu.matmul %231, %7, %cst_53 {dimension_numbers = #tpu.dot_dimension_numbers<[1], [0], [0], [1], [0, 0, 1, 1], [], []>} : vector<2x64xf32>, vector<64x256xf32>, vector<2x256xf32> -> vector<2x256xf32>
    %233 = arith.index_cast %228 : i32 to index
    %c0_54 = arith.constant 0 : index
    %234 = vector.load %arg9[%233, %c0_54] : memref<16x256xf32, #tpu.memory_space<vmem>>, vector<2x128xf32>
    %235 = vector.extract_strided_slice %232 {offsets = [0, 0], sizes = [2, 128], strides = [1, 1]} : vector<2x256xf32> to vector<2x128xf32>
    %236 = arith.addf %234, %235 : vector<2x128xf32>
    %237 = arith.index_cast %230 : i32 to index
    %c128_55 = arith.constant 128 : index
    %238 = vector.load %arg9[%237, %c128_55] : memref<16x256xf32, #tpu.memory_space<vmem>>, vector<2x128xf32>
    %239 = vector.extract_strided_slice %232 {offsets = [0, 128], sizes = [2, 128], strides = [1, 1]} : vector<2x256xf32> to vector<2x128xf32>
    %240 = arith.addf %238, %239 : vector<2x128xf32>
    %241 = vector.extract_strided_slice %236 {offsets = [0, 0], sizes = [2, 96], strides = [1, 1]} : vector<2x128xf32> to vector<2x96xf32>
    %242 = arith.negf %241 : vector<2x96xf32>
    %243 = math.exp %242 : vector<2x96xf32>
    %cst_56 = arith.constant 1.000000e+00 : f32
    %244 = vector.broadcast %cst_56 : f32 to vector<2x96xf32>
    %245 = arith.addf %244, %243 : vector<2x96xf32>
    %246 = arith.divf %244, %245 : vector<2x96xf32>
    %247 = vector.extract_strided_slice %236 {offsets = [0, 96], sizes = [2, 32], strides = [1, 1]} : vector<2x128xf32> to vector<2x32xf32>
    %248 = math.tanh %247 : vector<2x32xf32>
    %249 = vector.extract_strided_slice %246 {offsets = [0, 32], sizes = [2, 32], strides = [1, 1]} : vector<2x96xf32> to vector<2x32xf32>
    %250 = arith.mulf %249, %213 : vector<2x32xf32>
    %251 = vector.extract_strided_slice %246 {offsets = [0, 0], sizes = [2, 32], strides = [1, 1]} : vector<2x96xf32> to vector<2x32xf32>
    %252 = arith.mulf %251, %248 : vector<2x32xf32>
    %253 = arith.addf %250, %252 : vector<2x32xf32>
    %254 = vector.extract_strided_slice %246 {offsets = [0, 64], sizes = [2, 32], strides = [1, 1]} : vector<2x96xf32> to vector<2x32xf32>
    %255 = math.tanh %253 : vector<2x32xf32>
    %256 = arith.mulf %254, %255 : vector<2x32xf32>
    %257 = vector.extract_strided_slice %240 {offsets = [0, 0], sizes = [2, 96], strides = [1, 1]} : vector<2x128xf32> to vector<2x96xf32>
    %258 = arith.negf %257 : vector<2x96xf32>
    %259 = math.exp %258 : vector<2x96xf32>
    %cst_57 = arith.constant 1.000000e+00 : f32
    %260 = vector.broadcast %cst_57 : f32 to vector<2x96xf32>
    %261 = arith.addf %260, %259 : vector<2x96xf32>
    %262 = arith.divf %260, %261 : vector<2x96xf32>
    %263 = vector.extract_strided_slice %240 {offsets = [0, 96], sizes = [2, 32], strides = [1, 1]} : vector<2x128xf32> to vector<2x32xf32>
    %264 = math.tanh %263 : vector<2x32xf32>
    %265 = vector.extract_strided_slice %262 {offsets = [0, 32], sizes = [2, 32], strides = [1, 1]} : vector<2x96xf32> to vector<2x32xf32>
    %266 = arith.mulf %265, %219 : vector<2x32xf32>
    %267 = vector.extract_strided_slice %262 {offsets = [0, 0], sizes = [2, 32], strides = [1, 1]} : vector<2x96xf32> to vector<2x32xf32>
    %268 = arith.mulf %267, %264 : vector<2x32xf32>
    %269 = arith.addf %266, %268 : vector<2x32xf32>
    %270 = vector.extract_strided_slice %262 {offsets = [0, 64], sizes = [2, 32], strides = [1, 1]} : vector<2x96xf32> to vector<2x32xf32>
    %271 = math.tanh %269 : vector<2x32xf32>
    %272 = arith.mulf %270, %271 : vector<2x32xf32>
    %273 = arith.index_cast %228 : i32 to index
    %c0_58 = arith.constant 0 : index
    %274 = vector.load %arg1[%273, %c0_58] : memref<16x1xf32, #tpu.memory_space<vmem>>, vector<2x1xf32>
    %275 = arith.index_cast %230 : i32 to index
    %c0_59 = arith.constant 0 : index
    %276 = vector.load %arg1[%275, %c0_59] : memref<16x1xf32, #tpu.memory_space<vmem>>, vector<2x1xf32>
    %cst_60 = arith.constant 0.000000e+00 : f32
    %277 = vector.broadcast %cst_60 : f32 to vector<2x1xf32>
    %278 = arith.cmpf ogt, %274, %277 : vector<2x1xf32>
    %cst_61 = arith.constant 0.000000e+00 : f32
    %279 = vector.broadcast %cst_61 : f32 to vector<2x1xf32>
    %280 = arith.cmpf ogt, %276, %279 : vector<2x1xf32>
    %281 = vector.shape_cast %278 : vector<2x1xi1> to vector<2x1xi1>
    %282 = vector.broadcast %281 : vector<2x1xi1> to vector<2x32xi1>
    %283 = arith.select %282, %256, %210 : vector<2x32xi1>, vector<2x32xf32>
    %284 = vector.shape_cast %278 : vector<2x1xi1> to vector<2x1xi1>
    %285 = vector.broadcast %284 : vector<2x1xi1> to vector<2x32xi1>
    %286 = arith.select %285, %253, %213 : vector<2x32xi1>, vector<2x32xf32>
    %287 = vector.shape_cast %280 : vector<2x1xi1> to vector<2x1xi1>
    %288 = vector.broadcast %287 : vector<2x1xi1> to vector<2x32xi1>
    %289 = arith.select %288, %272, %216 : vector<2x32xi1>, vector<2x32xf32>
    %290 = vector.shape_cast %280 : vector<2x1xi1> to vector<2x1xi1>
    %291 = vector.broadcast %290 : vector<2x1xi1> to vector<2x32xi1>
    %292 = arith.select %291, %269, %219 : vector<2x32xi1>, vector<2x32xf32>
    %293 = vector.broadcast %274 : vector<2x1xf32> to vector<2x32xf32>
    %294 = arith.mulf %283, %293 : vector<2x32xf32>
    %295 = arith.index_cast %228 : i32 to index
    %c0_62 = arith.constant 0 : index
    %296 = vector.load %arg10[%295, %c0_62] : memref<16x32xf32, #tpu.memory_space<vmem>>, vector<2x32xf32>
    tpu.vector_store %arg10[%295, %c0_62], %294 {strides = array<i32>} : memref<16x32xf32, #tpu.memory_space<vmem>>, vector<2x32xf32>,
    %297 = vector.broadcast %276 : vector<2x1xf32> to vector<2x32xf32>
    %298 = arith.mulf %289, %297 : vector<2x32xf32>
    %299 = arith.index_cast %230 : i32 to index
    %c0_63 = arith.constant 0 : index
    %300 = vector.load %arg11[%299, %c0_63] : memref<16x32xf32, #tpu.memory_space<vmem>>, vector<2x32xf32>
    tpu.vector_store %arg11[%299, %c0_63], %298 {strides = array<i32>} : memref<16x32xf32, #tpu.memory_space<vmem>>, vector<2x32xf32>,
    %c4_i32 = arith.constant 4 : i32
    %c2_i32_64 = arith.constant 2 : i32
    %301 = arith.muli %c4_i32, %c2_i32_64 : i32
    %c7_i32_65 = arith.constant 7 : i32
    %302 = arith.subi %c7_i32_65, %c4_i32 : i32
    %c2_i32_66 = arith.constant 2 : i32
    %303 = arith.muli %302, %c2_i32_66 : i32
    %304 = tpu.concatenate %283, %289 in 1 : vector<2x32xf32>, vector<2x32xf32> -> vector<2x64xf32>
    %cst_67 = arith.constant dense<0.000000e+00> : vector<2x256xf32>
    %305 = tpu.matmul %304, %7, %cst_67 {dimension_numbers = #tpu.dot_dimension_numbers<[1], [0], [0], [1], [0, 0, 1, 1], [], []>} : vector<2x64xf32>, vector<64x256xf32>, vector<2x256xf32> -> vector<2x256xf32>
    %306 = arith.index_cast %301 : i32 to index
    %c0_68 = arith.constant 0 : index
    %307 = vector.load %arg9[%306, %c0_68] : memref<16x256xf32, #tpu.memory_space<vmem>>, vector<2x128xf32>
    %308 = vector.extract_strided_slice %305 {offsets = [0, 0], sizes = [2, 128], strides = [1, 1]} : vector<2x256xf32> to vector<2x128xf32>
    %309 = arith.addf %307, %308 : vector<2x128xf32>
    %310 = arith.index_cast %303 : i32 to index
    %c128_69 = arith.constant 128 : index
    %311 = vector.load %arg9[%310, %c128_69] : memref<16x256xf32, #tpu.memory_space<vmem>>, vector<2x128xf32>
    %312 = vector.extract_strided_slice %305 {offsets = [0, 128], sizes = [2, 128], strides = [1, 1]} : vector<2x256xf32> to vector<2x128xf32>
    %313 = arith.addf %311, %312 : vector<2x128xf32>
    %314 = vector.extract_strided_slice %309 {offsets = [0, 0], sizes = [2, 96], strides = [1, 1]} : vector<2x128xf32> to vector<2x96xf32>
    %315 = arith.negf %314 : vector<2x96xf32>
    %316 = math.exp %315 : vector<2x96xf32>
    %cst_70 = arith.constant 1.000000e+00 : f32
    %317 = vector.broadcast %cst_70 : f32 to vector<2x96xf32>
    %318 = arith.addf %317, %316 : vector<2x96xf32>
    %319 = arith.divf %317, %318 : vector<2x96xf32>
    %320 = vector.extract_strided_slice %309 {offsets = [0, 96], sizes = [2, 32], strides = [1, 1]} : vector<2x128xf32> to vector<2x32xf32>
    %321 = math.tanh %320 : vector<2x32xf32>
    %322 = vector.extract_strided_slice %319 {offsets = [0, 32], sizes = [2, 32], strides = [1, 1]} : vector<2x96xf32> to vector<2x32xf32>
    %323 = arith.mulf %322, %286 : vector<2x32xf32>
    %324 = vector.extract_strided_slice %319 {offsets = [0, 0], sizes = [2, 32], strides = [1, 1]} : vector<2x96xf32> to vector<2x32xf32>
    %325 = arith.mulf %324, %321 : vector<2x32xf32>
    %326 = arith.addf %323, %325 : vector<2x32xf32>
    %327 = vector.extract_strided_slice %319 {offsets = [0, 64], sizes = [2, 32], strides = [1, 1]} : vector<2x96xf32> to vector<2x32xf32>
    %328 = math.tanh %326 : vector<2x32xf32>
    %329 = arith.mulf %327, %328 : vector<2x32xf32>
    %330 = vector.extract_strided_slice %313 {offsets = [0, 0], sizes = [2, 96], strides = [1, 1]} : vector<2x128xf32> to vector<2x96xf32>
    %331 = arith.negf %330 : vector<2x96xf32>
    %332 = math.exp %331 : vector<2x96xf32>
    %cst_71 = arith.constant 1.000000e+00 : f32
    %333 = vector.broadcast %cst_71 : f32 to vector<2x96xf32>
    %334 = arith.addf %333, %332 : vector<2x96xf32>
    %335 = arith.divf %333, %334 : vector<2x96xf32>
    %336 = vector.extract_strided_slice %313 {offsets = [0, 96], sizes = [2, 32], strides = [1, 1]} : vector<2x128xf32> to vector<2x32xf32>
    %337 = math.tanh %336 : vector<2x32xf32>
    %338 = vector.extract_strided_slice %335 {offsets = [0, 32], sizes = [2, 32], strides = [1, 1]} : vector<2x96xf32> to vector<2x32xf32>
    %339 = arith.mulf %338, %292 : vector<2x32xf32>
    %340 = vector.extract_strided_slice %335 {offsets = [0, 0], sizes = [2, 32], strides = [1, 1]} : vector<2x96xf32> to vector<2x32xf32>
    %341 = arith.mulf %340, %337 : vector<2x32xf32>
    %342 = arith.addf %339, %341 : vector<2x32xf32>
    %343 = vector.extract_strided_slice %335 {offsets = [0, 64], sizes = [2, 32], strides = [1, 1]} : vector<2x96xf32> to vector<2x32xf32>
    %344 = math.tanh %342 : vector<2x32xf32>
    %345 = arith.mulf %343, %344 : vector<2x32xf32>
    %346 = arith.index_cast %301 : i32 to index
    %c0_72 = arith.constant 0 : index
    %347 = vector.load %arg1[%346, %c0_72] : memref<16x1xf32, #tpu.memory_space<vmem>>, vector<2x1xf32>
    %348 = arith.index_cast %303 : i32 to index
    %c0_73 = arith.constant 0 : index
    %349 = vector.load %arg1[%348, %c0_73] : memref<16x1xf32, #tpu.memory_space<vmem>>, vector<2x1xf32>
    %cst_74 = arith.constant 0.000000e+00 : f32
    %350 = vector.broadcast %cst_74 : f32 to vector<2x1xf32>
    %351 = arith.cmpf ogt, %347, %350 : vector<2x1xf32>
    %cst_75 = arith.constant 0.000000e+00 : f32
    %352 = vector.broadcast %cst_75 : f32 to vector<2x1xf32>
    %353 = arith.cmpf ogt, %349, %352 : vector<2x1xf32>
    %354 = vector.shape_cast %351 : vector<2x1xi1> to vector<2x1xi1>
    %355 = vector.broadcast %354 : vector<2x1xi1> to vector<2x32xi1>
    %356 = arith.select %355, %329, %283 : vector<2x32xi1>, vector<2x32xf32>
    %357 = vector.shape_cast %351 : vector<2x1xi1> to vector<2x1xi1>
    %358 = vector.broadcast %357 : vector<2x1xi1> to vector<2x32xi1>
    %359 = arith.select %358, %326, %286 : vector<2x32xi1>, vector<2x32xf32>
    %360 = vector.shape_cast %353 : vector<2x1xi1> to vector<2x1xi1>
    %361 = vector.broadcast %360 : vector<2x1xi1> to vector<2x32xi1>
    %362 = arith.select %361, %345, %289 : vector<2x32xi1>, vector<2x32xf32>
    %363 = vector.shape_cast %353 : vector<2x1xi1> to vector<2x1xi1>
    %364 = vector.broadcast %363 : vector<2x1xi1> to vector<2x32xi1>
    %365 = arith.select %364, %342, %292 : vector<2x32xi1>, vector<2x32xf32>
    %366 = vector.broadcast %347 : vector<2x1xf32> to vector<2x32xf32>
    %367 = arith.mulf %356, %366 : vector<2x32xf32>
    %368 = arith.index_cast %301 : i32 to index
    %c0_76 = arith.constant 0 : index
    %369 = vector.load %arg10[%368, %c0_76] : memref<16x32xf32, #tpu.memory_space<vmem>>, vector<2x32xf32>
    tpu.vector_store %arg10[%368, %c0_76], %367 {strides = array<i32>} : memref<16x32xf32, #tpu.memory_space<vmem>>, vector<2x32xf32>,
    %370 = vector.broadcast %349 : vector<2x1xf32> to vector<2x32xf32>
    %371 = arith.mulf %362, %370 : vector<2x32xf32>
    %372 = arith.index_cast %303 : i32 to index
    %c0_77 = arith.constant 0 : index
    %373 = vector.load %arg11[%372, %c0_77] : memref<16x32xf32, #tpu.memory_space<vmem>>, vector<2x32xf32>
    tpu.vector_store %arg11[%372, %c0_77], %371 {strides = array<i32>} : memref<16x32xf32, #tpu.memory_space<vmem>>, vector<2x32xf32>,
    %c5_i32 = arith.constant 5 : i32
    %c2_i32_78 = arith.constant 2 : i32
    %374 = arith.muli %c5_i32, %c2_i32_78 : i32
    %c7_i32_79 = arith.constant 7 : i32
    %375 = arith.subi %c7_i32_79, %c5_i32 : i32
    %c2_i32_80 = arith.constant 2 : i32
    %376 = arith.muli %375, %c2_i32_80 : i32
    %377 = tpu.concatenate %356, %362 in 1 : vector<2x32xf32>, vector<2x32xf32> -> vector<2x64xf32>
    %cst_81 = arith.constant dense<0.000000e+00> : vector<2x256xf32>
    %378 = tpu.matmul %377, %7, %cst_81 {dimension_numbers = #tpu.dot_dimension_numbers<[1], [0], [0], [1], [0, 0, 1, 1], [], []>} : vector<2x64xf32>, vector<64x256xf32>, vector<2x256xf32> -> vector<2x256xf32>
    %379 = arith.index_cast %374 : i32 to index
    %c0_82 = arith.constant 0 : index
    %380 = vector.load %arg9[%379, %c0_82] : memref<16x256xf32, #tpu.memory_space<vmem>>, vector<2x128xf32>
    %381 = vector.extract_strided_slice %378 {offsets = [0, 0], sizes = [2, 128], strides = [1, 1]} : vector<2x256xf32> to vector<2x128xf32>
    %382 = arith.addf %380, %381 : vector<2x128xf32>
    %383 = arith.index_cast %376 : i32 to index
    %c128_83 = arith.constant 128 : index
    %384 = vector.load %arg9[%383, %c128_83] : memref<16x256xf32, #tpu.memory_space<vmem>>, vector<2x128xf32>
    %385 = vector.extract_strided_slice %378 {offsets = [0, 128], sizes = [2, 128], strides = [1, 1]} : vector<2x256xf32> to vector<2x128xf32>
    %386 = arith.addf %384, %385 : vector<2x128xf32>
    %387 = vector.extract_strided_slice %382 {offsets = [0, 0], sizes = [2, 96], strides = [1, 1]} : vector<2x128xf32> to vector<2x96xf32>
    %388 = arith.negf %387 : vector<2x96xf32>
    %389 = math.exp %388 : vector<2x96xf32>
    %cst_84 = arith.constant 1.000000e+00 : f32
    %390 = vector.broadcast %cst_84 : f32 to vector<2x96xf32>
    %391 = arith.addf %390, %389 : vector<2x96xf32>
    %392 = arith.divf %390, %391 : vector<2x96xf32>
    %393 = vector.extract_strided_slice %382 {offsets = [0, 96], sizes = [2, 32], strides = [1, 1]} : vector<2x128xf32> to vector<2x32xf32>
    %394 = math.tanh %393 : vector<2x32xf32>
    %395 = vector.extract_strided_slice %392 {offsets = [0, 32], sizes = [2, 32], strides = [1, 1]} : vector<2x96xf32> to vector<2x32xf32>
    %396 = arith.mulf %395, %359 : vector<2x32xf32>
    %397 = vector.extract_strided_slice %392 {offsets = [0, 0], sizes = [2, 32], strides = [1, 1]} : vector<2x96xf32> to vector<2x32xf32>
    %398 = arith.mulf %397, %394 : vector<2x32xf32>
    %399 = arith.addf %396, %398 : vector<2x32xf32>
    %400 = vector.extract_strided_slice %392 {offsets = [0, 64], sizes = [2, 32], strides = [1, 1]} : vector<2x96xf32> to vector<2x32xf32>
    %401 = math.tanh %399 : vector<2x32xf32>
    %402 = arith.mulf %400, %401 : vector<2x32xf32>
    %403 = vector.extract_strided_slice %386 {offsets = [0, 0], sizes = [2, 96], strides = [1, 1]} : vector<2x128xf32> to vector<2x96xf32>
    %404 = arith.negf %403 : vector<2x96xf32>
    %405 = math.exp %404 : vector<2x96xf32>
    %cst_85 = arith.constant 1.000000e+00 : f32
    %406 = vector.broadcast %cst_85 : f32 to vector<2x96xf32>
    %407 = arith.addf %406, %405 : vector<2x96xf32>
    %408 = arith.divf %406, %407 : vector<2x96xf32>
    %409 = vector.extract_strided_slice %386 {offsets = [0, 96], sizes = [2, 32], strides = [1, 1]} : vector<2x128xf32> to vector<2x32xf32>
    %410 = math.tanh %409 : vector<2x32xf32>
    %411 = vector.extract_strided_slice %408 {offsets = [0, 32], sizes = [2, 32], strides = [1, 1]} : vector<2x96xf32> to vector<2x32xf32>
    %412 = arith.mulf %411, %365 : vector<2x32xf32>
    %413 = vector.extract_strided_slice %408 {offsets = [0, 0], sizes = [2, 32], strides = [1, 1]} : vector<2x96xf32> to vector<2x32xf32>
    %414 = arith.mulf %413, %410 : vector<2x32xf32>
    %415 = arith.addf %412, %414 : vector<2x32xf32>
    %416 = vector.extract_strided_slice %408 {offsets = [0, 64], sizes = [2, 32], strides = [1, 1]} : vector<2x96xf32> to vector<2x32xf32>
    %417 = math.tanh %415 : vector<2x32xf32>
    %418 = arith.mulf %416, %417 : vector<2x32xf32>
    %419 = arith.index_cast %374 : i32 to index
    %c0_86 = arith.constant 0 : index
    %420 = vector.load %arg1[%419, %c0_86] : memref<16x1xf32, #tpu.memory_space<vmem>>, vector<2x1xf32>
    %421 = arith.index_cast %376 : i32 to index
    %c0_87 = arith.constant 0 : index
    %422 = vector.load %arg1[%421, %c0_87] : memref<16x1xf32, #tpu.memory_space<vmem>>, vector<2x1xf32>
    %cst_88 = arith.constant 0.000000e+00 : f32
    %423 = vector.broadcast %cst_88 : f32 to vector<2x1xf32>
    %424 = arith.cmpf ogt, %420, %423 : vector<2x1xf32>
    %cst_89 = arith.constant 0.000000e+00 : f32
    %425 = vector.broadcast %cst_89 : f32 to vector<2x1xf32>
    %426 = arith.cmpf ogt, %422, %425 : vector<2x1xf32>
    %427 = vector.shape_cast %424 : vector<2x1xi1> to vector<2x1xi1>
    %428 = vector.broadcast %427 : vector<2x1xi1> to vector<2x32xi1>
    %429 = arith.select %428, %402, %356 : vector<2x32xi1>, vector<2x32xf32>
    %430 = vector.shape_cast %424 : vector<2x1xi1> to vector<2x1xi1>
    %431 = vector.broadcast %430 : vector<2x1xi1> to vector<2x32xi1>
    %432 = arith.select %431, %399, %359 : vector<2x32xi1>, vector<2x32xf32>
    %433 = vector.shape_cast %426 : vector<2x1xi1> to vector<2x1xi1>
    %434 = vector.broadcast %433 : vector<2x1xi1> to vector<2x32xi1>
    %435 = arith.select %434, %418, %362 : vector<2x32xi1>, vector<2x32xf32>
    %436 = vector.shape_cast %426 : vector<2x1xi1> to vector<2x1xi1>
    %437 = vector.broadcast %436 : vector<2x1xi1> to vector<2x32xi1>
    %438 = arith.select %437, %415, %365 : vector<2x32xi1>, vector<2x32xf32>
    %439 = vector.broadcast %420 : vector<2x1xf32> to vector<2x32xf32>
    %440 = arith.mulf %429, %439 : vector<2x32xf32>
    %441 = arith.index_cast %374 : i32 to index
    %c0_90 = arith.constant 0 : index
    %442 = vector.load %arg10[%441, %c0_90] : memref<16x32xf32, #tpu.memory_space<vmem>>, vector<2x32xf32>
    tpu.vector_store %arg10[%441, %c0_90], %440 {strides = array<i32>} : memref<16x32xf32, #tpu.memory_space<vmem>>, vector<2x32xf32>,
    %443 = vector.broadcast %422 : vector<2x1xf32> to vector<2x32xf32>
    %444 = arith.mulf %435, %443 : vector<2x32xf32>
    %445 = arith.index_cast %376 : i32 to index
    %c0_91 = arith.constant 0 : index
    %446 = vector.load %arg11[%445, %c0_91] : memref<16x32xf32, #tpu.memory_space<vmem>>, vector<2x32xf32>
    tpu.vector_store %arg11[%445, %c0_91], %444 {strides = array<i32>} : memref<16x32xf32, #tpu.memory_space<vmem>>, vector<2x32xf32>,
    %c6_i32 = arith.constant 6 : i32
    %c2_i32_92 = arith.constant 2 : i32
    %447 = arith.muli %c6_i32, %c2_i32_92 : i32
    %c7_i32_93 = arith.constant 7 : i32
    %448 = arith.subi %c7_i32_93, %c6_i32 : i32
    %c2_i32_94 = arith.constant 2 : i32
    %449 = arith.muli %448, %c2_i32_94 : i32
    %450 = tpu.concatenate %429, %435 in 1 : vector<2x32xf32>, vector<2x32xf32> -> vector<2x64xf32>
    %cst_95 = arith.constant dense<0.000000e+00> : vector<2x256xf32>
    %451 = tpu.matmul %450, %7, %cst_95 {dimension_numbers = #tpu.dot_dimension_numbers<[1], [0], [0], [1], [0, 0, 1, 1], [], []>} : vector<2x64xf32>, vector<64x256xf32>, vector<2x256xf32> -> vector<2x256xf32>
    %452 = arith.index_cast %447 : i32 to index
    %c0_96 = arith.constant 0 : index
    %453 = vector.load %arg9[%452, %c0_96] : memref<16x256xf32, #tpu.memory_space<vmem>>, vector<2x128xf32>
    %454 = vector.extract_strided_slice %451 {offsets = [0, 0], sizes = [2, 128], strides = [1, 1]} : vector<2x256xf32> to vector<2x128xf32>
    %455 = arith.addf %453, %454 : vector<2x128xf32>
    %456 = arith.index_cast %449 : i32 to index
    %c128_97 = arith.constant 128 : index
    %457 = vector.load %arg9[%456, %c128_97] : memref<16x256xf32, #tpu.memory_space<vmem>>, vector<2x128xf32>
    %458 = vector.extract_strided_slice %451 {offsets = [0, 128], sizes = [2, 128], strides = [1, 1]} : vector<2x256xf32> to vector<2x128xf32>
    %459 = arith.addf %457, %458 : vector<2x128xf32>
    %460 = vector.extract_strided_slice %455 {offsets = [0, 0], sizes = [2, 96], strides = [1, 1]} : vector<2x128xf32> to vector<2x96xf32>
    %461 = arith.negf %460 : vector<2x96xf32>
    %462 = math.exp %461 : vector<2x96xf32>
    %cst_98 = arith.constant 1.000000e+00 : f32
    %463 = vector.broadcast %cst_98 : f32 to vector<2x96xf32>
    %464 = arith.addf %463, %462 : vector<2x96xf32>
    %465 = arith.divf %463, %464 : vector<2x96xf32>
    %466 = vector.extract_strided_slice %455 {offsets = [0, 96], sizes = [2, 32], strides = [1, 1]} : vector<2x128xf32> to vector<2x32xf32>
    %467 = math.tanh %466 : vector<2x32xf32>
    %468 = vector.extract_strided_slice %465 {offsets = [0, 32], sizes = [2, 32], strides = [1, 1]} : vector<2x96xf32> to vector<2x32xf32>
    %469 = arith.mulf %468, %432 : vector<2x32xf32>
    %470 = vector.extract_strided_slice %465 {offsets = [0, 0], sizes = [2, 32], strides = [1, 1]} : vector<2x96xf32> to vector<2x32xf32>
    %471 = arith.mulf %470, %467 : vector<2x32xf32>
    %472 = arith.addf %469, %471 : vector<2x32xf32>
    %473 = vector.extract_strided_slice %465 {offsets = [0, 64], sizes = [2, 32], strides = [1, 1]} : vector<2x96xf32> to vector<2x32xf32>
    %474 = math.tanh %472 : vector<2x32xf32>
    %475 = arith.mulf %473, %474 : vector<2x32xf32>
    %476 = vector.extract_strided_slice %459 {offsets = [0, 0], sizes = [2, 96], strides = [1, 1]} : vector<2x128xf32> to vector<2x96xf32>
    %477 = arith.negf %476 : vector<2x96xf32>
    %478 = math.exp %477 : vector<2x96xf32>
    %cst_99 = arith.constant 1.000000e+00 : f32
    %479 = vector.broadcast %cst_99 : f32 to vector<2x96xf32>
    %480 = arith.addf %479, %478 : vector<2x96xf32>
    %481 = arith.divf %479, %480 : vector<2x96xf32>
    %482 = vector.extract_strided_slice %459 {offsets = [0, 96], sizes = [2, 32], strides = [1, 1]} : vector<2x128xf32> to vector<2x32xf32>
    %483 = math.tanh %482 : vector<2x32xf32>
    %484 = vector.extract_strided_slice %481 {offsets = [0, 32], sizes = [2, 32], strides = [1, 1]} : vector<2x96xf32> to vector<2x32xf32>
    %485 = arith.mulf %484, %438 : vector<2x32xf32>
    %486 = vector.extract_strided_slice %481 {offsets = [0, 0], sizes = [2, 32], strides = [1, 1]} : vector<2x96xf32> to vector<2x32xf32>
    %487 = arith.mulf %486, %483 : vector<2x32xf32>
    %488 = arith.addf %485, %487 : vector<2x32xf32>
    %489 = vector.extract_strided_slice %481 {offsets = [0, 64], sizes = [2, 32], strides = [1, 1]} : vector<2x96xf32> to vector<2x32xf32>
    %490 = math.tanh %488 : vector<2x32xf32>
    %491 = arith.mulf %489, %490 : vector<2x32xf32>
    %492 = arith.index_cast %447 : i32 to index
    %c0_100 = arith.constant 0 : index
    %493 = vector.load %arg1[%492, %c0_100] : memref<16x1xf32, #tpu.memory_space<vmem>>, vector<2x1xf32>
    %494 = arith.index_cast %449 : i32 to index
    %c0_101 = arith.constant 0 : index
    %495 = vector.load %arg1[%494, %c0_101] : memref<16x1xf32, #tpu.memory_space<vmem>>, vector<2x1xf32>
    %cst_102 = arith.constant 0.000000e+00 : f32
    %496 = vector.broadcast %cst_102 : f32 to vector<2x1xf32>
    %497 = arith.cmpf ogt, %493, %496 : vector<2x1xf32>
    %cst_103 = arith.constant 0.000000e+00 : f32
    %498 = vector.broadcast %cst_103 : f32 to vector<2x1xf32>
    %499 = arith.cmpf ogt, %495, %498 : vector<2x1xf32>
    %500 = vector.shape_cast %497 : vector<2x1xi1> to vector<2x1xi1>
    %501 = vector.broadcast %500 : vector<2x1xi1> to vector<2x32xi1>
    %502 = arith.select %501, %475, %429 : vector<2x32xi1>, vector<2x32xf32>
    %503 = vector.shape_cast %497 : vector<2x1xi1> to vector<2x1xi1>
    %504 = vector.broadcast %503 : vector<2x1xi1> to vector<2x32xi1>
    %505 = arith.select %504, %472, %432 : vector<2x32xi1>, vector<2x32xf32>
    %506 = vector.shape_cast %499 : vector<2x1xi1> to vector<2x1xi1>
    %507 = vector.broadcast %506 : vector<2x1xi1> to vector<2x32xi1>
    %508 = arith.select %507, %491, %435 : vector<2x32xi1>, vector<2x32xf32>
    %509 = vector.shape_cast %499 : vector<2x1xi1> to vector<2x1xi1>
    %510 = vector.broadcast %509 : vector<2x1xi1> to vector<2x32xi1>
    %511 = arith.select %510, %488, %438 : vector<2x32xi1>, vector<2x32xf32>
    %512 = vector.broadcast %493 : vector<2x1xf32> to vector<2x32xf32>
    %513 = arith.mulf %502, %512 : vector<2x32xf32>
    %514 = arith.index_cast %447 : i32 to index
    %c0_104 = arith.constant 0 : index
    %515 = vector.load %arg10[%514, %c0_104] : memref<16x32xf32, #tpu.memory_space<vmem>>, vector<2x32xf32>
    tpu.vector_store %arg10[%514, %c0_104], %513 {strides = array<i32>} : memref<16x32xf32, #tpu.memory_space<vmem>>, vector<2x32xf32>,
    %516 = vector.broadcast %495 : vector<2x1xf32> to vector<2x32xf32>
    %517 = arith.mulf %508, %516 : vector<2x32xf32>
    %518 = arith.index_cast %449 : i32 to index
    %c0_105 = arith.constant 0 : index
    %519 = vector.load %arg11[%518, %c0_105] : memref<16x32xf32, #tpu.memory_space<vmem>>, vector<2x32xf32>
    tpu.vector_store %arg11[%518, %c0_105], %517 {strides = array<i32>} : memref<16x32xf32, #tpu.memory_space<vmem>>, vector<2x32xf32>,
    %c7_i32_106 = arith.constant 7 : i32
    %c2_i32_107 = arith.constant 2 : i32
    %520 = arith.muli %c7_i32_106, %c2_i32_107 : i32
    %c7_i32_108 = arith.constant 7 : i32
    %521 = arith.subi %c7_i32_108, %c7_i32_106 : i32
    %c2_i32_109 = arith.constant 2 : i32
    %522 = arith.muli %521, %c2_i32_109 : i32
    %523 = tpu.concatenate %502, %508 in 1 : vector<2x32xf32>, vector<2x32xf32> -> vector<2x64xf32>
    %cst_110 = arith.constant dense<0.000000e+00> : vector<2x256xf32>
    %524 = tpu.matmul %523, %7, %cst_110 {dimension_numbers = #tpu.dot_dimension_numbers<[1], [0], [0], [1], [0, 0, 1, 1], [], []>} : vector<2x64xf32>, vector<64x256xf32>, vector<2x256xf32> -> vector<2x256xf32>
    %525 = arith.index_cast %520 : i32 to index
    %c0_111 = arith.constant 0 : index
    %526 = vector.load %arg9[%525, %c0_111] : memref<16x256xf32, #tpu.memory_space<vmem>>, vector<2x128xf32>
    %527 = vector.extract_strided_slice %524 {offsets = [0, 0], sizes = [2, 128], strides = [1, 1]} : vector<2x256xf32> to vector<2x128xf32>
    %528 = arith.addf %526, %527 : vector<2x128xf32>
    %529 = arith.index_cast %522 : i32 to index
    %c128_112 = arith.constant 128 : index
    %530 = vector.load %arg9[%529, %c128_112] : memref<16x256xf32, #tpu.memory_space<vmem>>, vector<2x128xf32>
    %531 = vector.extract_strided_slice %524 {offsets = [0, 128], sizes = [2, 128], strides = [1, 1]} : vector<2x256xf32> to vector<2x128xf32>
    %532 = arith.addf %530, %531 : vector<2x128xf32>
    %533 = vector.extract_strided_slice %528 {offsets = [0, 0], sizes = [2, 96], strides = [1, 1]} : vector<2x128xf32> to vector<2x96xf32>
    %534 = arith.negf %533 : vector<2x96xf32>
    %535 = math.exp %534 : vector<2x96xf32>
    %cst_113 = arith.constant 1.000000e+00 : f32
    %536 = vector.broadcast %cst_113 : f32 to vector<2x96xf32>
    %537 = arith.addf %536, %535 : vector<2x96xf32>
    %538 = arith.divf %536, %537 : vector<2x96xf32>
    %539 = vector.extract_strided_slice %528 {offsets = [0, 96], sizes = [2, 32], strides = [1, 1]} : vector<2x128xf32> to vector<2x32xf32>
    %540 = math.tanh %539 : vector<2x32xf32>
    %541 = vector.extract_strided_slice %538 {offsets = [0, 32], sizes = [2, 32], strides = [1, 1]} : vector<2x96xf32> to vector<2x32xf32>
    %542 = arith.mulf %541, %505 : vector<2x32xf32>
    %543 = vector.extract_strided_slice %538 {offsets = [0, 0], sizes = [2, 32], strides = [1, 1]} : vector<2x96xf32> to vector<2x32xf32>
    %544 = arith.mulf %543, %540 : vector<2x32xf32>
    %545 = arith.addf %542, %544 : vector<2x32xf32>
    %546 = vector.extract_strided_slice %538 {offsets = [0, 64], sizes = [2, 32], strides = [1, 1]} : vector<2x96xf32> to vector<2x32xf32>
    %547 = math.tanh %545 : vector<2x32xf32>
    %548 = arith.mulf %546, %547 : vector<2x32xf32>
    %549 = vector.extract_strided_slice %532 {offsets = [0, 0], sizes = [2, 96], strides = [1, 1]} : vector<2x128xf32> to vector<2x96xf32>
    %550 = arith.negf %549 : vector<2x96xf32>
    %551 = math.exp %550 : vector<2x96xf32>
    %cst_114 = arith.constant 1.000000e+00 : f32
    %552 = vector.broadcast %cst_114 : f32 to vector<2x96xf32>
    %553 = arith.addf %552, %551 : vector<2x96xf32>
    %554 = arith.divf %552, %553 : vector<2x96xf32>
    %555 = vector.extract_strided_slice %532 {offsets = [0, 96], sizes = [2, 32], strides = [1, 1]} : vector<2x128xf32> to vector<2x32xf32>
    %556 = math.tanh %555 : vector<2x32xf32>
    %557 = vector.extract_strided_slice %554 {offsets = [0, 32], sizes = [2, 32], strides = [1, 1]} : vector<2x96xf32> to vector<2x32xf32>
    %558 = arith.mulf %557, %511 : vector<2x32xf32>
    %559 = vector.extract_strided_slice %554 {offsets = [0, 0], sizes = [2, 32], strides = [1, 1]} : vector<2x96xf32> to vector<2x32xf32>
    %560 = arith.mulf %559, %556 : vector<2x32xf32>
    %561 = arith.addf %558, %560 : vector<2x32xf32>
    %562 = vector.extract_strided_slice %554 {offsets = [0, 64], sizes = [2, 32], strides = [1, 1]} : vector<2x96xf32> to vector<2x32xf32>
    %563 = math.tanh %561 : vector<2x32xf32>
    %564 = arith.mulf %562, %563 : vector<2x32xf32>
    %565 = arith.index_cast %520 : i32 to index
    %c0_115 = arith.constant 0 : index
    %566 = vector.load %arg1[%565, %c0_115] : memref<16x1xf32, #tpu.memory_space<vmem>>, vector<2x1xf32>
    %567 = arith.index_cast %522 : i32 to index
    %c0_116 = arith.constant 0 : index
    %568 = vector.load %arg1[%567, %c0_116] : memref<16x1xf32, #tpu.memory_space<vmem>>, vector<2x1xf32>
    %cst_117 = arith.constant 0.000000e+00 : f32
    %569 = vector.broadcast %cst_117 : f32 to vector<2x1xf32>
    %570 = arith.cmpf ogt, %566, %569 : vector<2x1xf32>
    %cst_118 = arith.constant 0.000000e+00 : f32
    %571 = vector.broadcast %cst_118 : f32 to vector<2x1xf32>
    %572 = arith.cmpf ogt, %568, %571 : vector<2x1xf32>
    %573 = vector.shape_cast %570 : vector<2x1xi1> to vector<2x1xi1>
    %574 = vector.broadcast %573 : vector<2x1xi1> to vector<2x32xi1>
    %575 = arith.select %574, %548, %502 : vector<2x32xi1>, vector<2x32xf32>
    %576 = vector.shape_cast %570 : vector<2x1xi1> to vector<2x1xi1>
    %577 = vector.broadcast %576 : vector<2x1xi1> to vector<2x32xi1>
    %578 = arith.select %577, %545, %505 : vector<2x32xi1>, vector<2x32xf32>
    %579 = vector.shape_cast %572 : vector<2x1xi1> to vector<2x1xi1>
    %580 = vector.broadcast %579 : vector<2x1xi1> to vector<2x32xi1>
    %581 = arith.select %580, %564, %508 : vector<2x32xi1>, vector<2x32xf32>
    %582 = vector.shape_cast %572 : vector<2x1xi1> to vector<2x1xi1>
    %583 = vector.broadcast %582 : vector<2x1xi1> to vector<2x32xi1>
    %584 = arith.select %583, %561, %511 : vector<2x32xi1>, vector<2x32xf32>
    %585 = vector.broadcast %566 : vector<2x1xf32> to vector<2x32xf32>
    %586 = arith.mulf %575, %585 : vector<2x32xf32>
    %587 = arith.index_cast %520 : i32 to index
    %c0_119 = arith.constant 0 : index
    %588 = vector.load %arg10[%587, %c0_119] : memref<16x32xf32, #tpu.memory_space<vmem>>, vector<2x32xf32>
    tpu.vector_store %arg10[%587, %c0_119], %586 {strides = array<i32>} : memref<16x32xf32, #tpu.memory_space<vmem>>, vector<2x32xf32>,
    %589 = vector.broadcast %568 : vector<2x1xf32> to vector<2x32xf32>
    %590 = arith.mulf %581, %589 : vector<2x32xf32>
    %591 = arith.index_cast %522 : i32 to index
    %c0_120 = arith.constant 0 : index
    %592 = vector.load %arg11[%591, %c0_120] : memref<16x32xf32, #tpu.memory_space<vmem>>, vector<2x32xf32>
    tpu.vector_store %arg11[%591, %c0_120], %590 {strides = array<i32>} : memref<16x32xf32, #tpu.memory_space<vmem>>, vector<2x32xf32>,
    %c8_i32 = arith.constant 8 : i32
    %c0_121 = arith.constant 0 : index
    %c0_122 = arith.constant 0 : index
    %593 = vector.load %arg10[%c0_121, %c0_122] : memref<16x32xf32, #tpu.memory_space<vmem>>, vector<16x32xf32>
    %c0_123 = arith.constant 0 : index
    %c0_124 = arith.constant 0 : index
    %594 = vector.load %arg5[%c0_123, %c0_124] : memref<32x8xf32, #tpu.memory_space<vmem>>, vector<32x8xf32>
    %cst_125 = arith.constant dense<0.000000e+00> : vector<16x8xf32>
    %595 = tpu.matmul %593, %594, %cst_125 {dimension_numbers = #tpu.dot_dimension_numbers<[1], [0], [0], [1], [0, 0, 1, 1], [], []>} : vector<16x32xf32>, vector<32x8xf32>, vector<16x8xf32> -> vector<16x8xf32>
    %c0_126 = arith.constant 0 : index
    %c0_127 = arith.constant 0 : index
    %596 = vector.load %arg11[%c0_126, %c0_127] : memref<16x32xf32, #tpu.memory_space<vmem>>, vector<16x32xf32>
    %c0_128 = arith.constant 0 : index
    %c0_129 = arith.constant 0 : index
    %597 = vector.load %arg6[%c0_128, %c0_129] : memref<32x8xf32, #tpu.memory_space<vmem>>, vector<32x8xf32>
    %cst_130 = arith.constant dense<0.000000e+00> : vector<16x8xf32>
    %598 = tpu.matmul %596, %597, %cst_130 {dimension_numbers = #tpu.dot_dimension_numbers<[1], [0], [0], [1], [0, 0, 1, 1], [], []>} : vector<16x32xf32>, vector<32x8xf32>, vector<16x8xf32> -> vector<16x8xf32>
    %599 = arith.addf %595, %598 : vector<16x8xf32>
    %c0_131 = arith.constant 0 : index
    %c0_132 = arith.constant 0 : index
    %600 = vector.load %arg7[%c0_131, %c0_132] : memref<1x8xf32, #tpu.memory_space<vmem>>, vector<1x8xf32>
    %601 = vector.broadcast %600 : vector<1x8xf32> to vector<16x8xf32>
    %602 = arith.addf %599, %601 : vector<16x8xf32>
    %c0_133 = arith.constant 0 : index
    %c0_134 = arith.constant 0 : index
    %603 = vector.load %arg8[%c0_133, %c0_134] : memref<16x8xf32, #tpu.memory_space<vmem>>, vector<16x8xf32>
    tpu.vector_store %arg8[%c0_133, %c0_134], %602 {strides = array<i32>} : memref<16x8xf32, #tpu.memory_space<vmem>>, vector<16x8xf32>,
    return
  }
}

</mosaic_0001>

<bundles_post_ra>
// kernel: tpu_custom_call.1
= control target key start
LH: loop header
LB: loop body
LE: loop exit
PB: predicated region body
PF: predicated region fallthrough
CT: control target
= control target key end

     0   :  { %13 = vsyncpa [#allocation6], 0  ;;  %s2161_s27 = smov [#allocation5]   ;;  %s2873_s0 = inlined_call_operand.vmem [shape: f32[16,32], index: 0, kind: input, shape index: {}]   ;;  %s2874_s1 = inlined_call_operand.vmem [shape: f32[16,1], index: 1, kind: input, shape index: {}]   ;;  %s2875_s2 = inlined_call_operand.vmem [shape: f32[32,256], index: 2, kind: input, shape index: {}]   ;;  %s2876_s3 = inlined_call_operand.vmem [shape: f32[1,256], index: 3, kind: input, shape index: {}]   ;;  %s2877_s4 = inlined_call_operand.hbm [shape: f32[64,256], index: 4, kind: input, shape index: {}]   ;;  %s2878_s5 = inlined_call_operand.vmem [shape: f32[32,8], index: 5, kind: input, shape index: {}]   ;;  %s2879_s6 = inlined_call_operand.vmem [shape: f32[32,8], index: 6, kind: input, shape index: {}]   ;;  %s2880_s7 = inlined_call_operand.vmem [shape: f32[1,8], index: 7, kind: input, shape index: {}]   ;;  %s2881_s8 = inlined_call_operand.vmem [shape: f32[16,8], index: 8, kind: output, shape index: {}]  }
   0x1   :  { %s27_s28 = sshll.u32 %s2161_s27, 4  ;;  %s28_s28 = int_to_ptr.vmem [resolvable:$true] %s27_s28 }
   0x2   :  { %s2147_s29 = scalar_lea.vmem %s28_s28, 2048  ;;  %p2152_p1 = scmp.lt.s32.totalorder %s28_s28, %s28_s28 }
   0x3   :  { %p2148_p0 = scmp.ne.s32.totalorder %s28_s28, %s2147_s29  ;;  %p2153_p2 = scmp.lt.s32.totalorder %s2147_s29, %s2147_s29 }
   0x5   :  { %p2154_p3 = por %p2153_p2, %p2152_p1 }
   0x7   :  { %p2155_p4 = pnand %p2154_p3, %p2148_p0 }
   0x9   :  { %2158 = shalt.err (!%p2155_p4)
}
   0xa   :  { %s2162_s30 = smov 256   ;;  %s2163_s9 = smov 16  }
   0xb   :  { %33 = dma.hbm_to_vmem [thread:$0]  %s2877_s4, 2048, %s28_s28, [#allocation6], %s2162_s30, %s2162_s30, %s2163_s9  }
   0xc   :  { %2159 = dma.done.wait [#allocation6], 2048  }
   0xd   :  { %2160 = vsyncadd [#allocation6], 4294965248  ;;  %v2164_v0 = vmov 0.0   ;;  %v52_v1 = vld [vmem:[%s2875_s2 + $0x38] sm:$0xff]  ;;  %v51_v2 = vld [vmem:[%s2875_s2 + $0x30] sm:$0xff]  ;;  %vm65_vm0 = vcmask 261120   ;;  %v55_v27 = vlaneseq }
   0xe   :  { %136 = vmatprep.mubr.f32.mxu0 %v2164_v0  ;;  %237 = vmatprep.mubr.f32.mxu1 %v2164_v0  ;;  %v50_v3 = vld [vmem:[%s2875_s2 + $0x28] sm:$0xff]  ;;  %v2228_v4 = vld [vmem:[#allocation5 + $0x78] sm:$0xff]  ;;  %v49_v5 = vld [vmem:[%s2875_s2 + $0x20] sm:$0xff]  ;;  %v2165_v49 = vmov 0   ;;  %s2167_s13 = smov 64   ;;  %s2168_s14 = smov 96  }
   0xf   :  { %96 = vmatprep.subr.mxu0 %v52_v1  ;;  %v2233_v6 = vld [vmem:[#allocation5 + $0x70] sm:$0xff]  ;;  %189 = vmatprep.subr.mxu1 %v2228_v4  ;;  %v48_v7 = vld [vmem:[%s2875_s2 + $0x18] sm:$0xff]  ;;  %v2239_v8 = vld [vmem:[#allocation5 + $0x68] sm:$0xff]  ;;  %v56_v28 = vshrl.u32 %v55_v27, 7  ;;  %vm169_vm5 = vcmask 523264  }
  0x10   :  { %97 = vmatpush1.msra.mxu0 %v51_v2  ;;  %190 = vmatpush1.msra.mxu1 %v2233_v6  ;;  %v47_v9 = vld [vmem:[%s2875_s2 + $0x10] sm:$0xff]  ;;  %v2245_v10 = vld [vmem:[#allocation5 + $0x60] sm:$0xff]  ;;  %v2247_v11 = vld [vmem:[#allocation5 + $0x58] sm:$0xff] }
  0x11   :  { %98 = vmatprep.subr.mxu0 %v50_v3  ;;  %191 = vmatprep.subr.mxu1 %v2239_v8  ;;  %v46_v12 = vld [vmem:[%s2875_s2 + $0x8] sm:$0xff]  ;;  %v2253_v13 = vld [vmem:[#allocation5 + $0x50] sm:$0xff]  ;;  %v45_v14 = vld [vmem:[%s2875_s2] sm:$0xff]  ;;  %v57_v29 = vsub.s32 0, %v56_v28  ;;  %v61_v31 = vsub.s32 1, %v56_v28 }
  0x12   :  { %99 = vmatpush1.msra.mxu0 %v49_v5  ;;  %192 = vmatpush1.msra.mxu1 %v2245_v10  ;;  %v2259_v15 = vld [vmem:[#allocation5 + $0x48] sm:$0xff]  ;;  %v43_v16 = vld [vmem:[%s2873_s0] sm:$0xff]  ;;  %v2268_v18 = vld [vmem:[#allocation5 + $0x38] sm:$0xff] }
  0x13   :  { %100 = vmatprep.subr.mxu0 %v48_v7  ;;  %193 = vmatprep.subr.mxu1 %v2247_v11  ;;  %v2265_v17 = vld [vmem:[#allocation5 + $0x40] sm:$0xff]  ;;  %v2271_v19 = vld [vmem:[#allocation5 + $0x30] sm:$0xff]  ;;  %v2275_v20 = vld [vmem:[#allocation5 + $0x28] sm:$0xff] }
  0x14   :  { %101 = vmatpush1.msra.mxu0 %v47_v9  ;;  %194 = vmatpush1.msra.mxu1 %v2253_v13  ;;  %v44_v21 = vld [vmem:[%s2873_s0 + $0x8] sm:$0xff]  ;;  %v2282_v22 = vld [vmem:[#allocation5 + $0x20] sm:$0xff]  ;;  %v2285_v23 = vld [vmem:[#allocation5 + $0x18] sm:$0xff] }
  0x15   :  { %102 = vmatprep.subr.mxu0 %v46_v12  ;;  %195 = vmatprep.subr.mxu1 %v2259_v15  ;;  %v2289_v24 = vld [vmem:[#allocation5 + $0x10] sm:$0xff]  ;;  %v2294_v25 = vld [vmem:[#allocation5 + $0x8] sm:$0xff]  ;;  %v2297_v26 = vld [vmem:[#allocation5] sm:$0xff] }
  0x16   :  { %103 = vmatpush1.msra.mxu0 %v45_v14  ;;  %196 = vmatpush1.msra.mxu1 %v2265_v17  ;;  %v53_v30 = vld [vmem:[%s2876_s3] sm:$0x3]  ;;  %s2166_s3 = smov 32  }
  0x17   :  { %1917 = vmatmul.mubr.msk.f32.vlgmr.msra.gmra.mxu0 %vm65_vm0, %v43_v16  ;;  %197 = vmatprep.subr.mxu1 %v2268_v18  ;;  %v58_v32 = vrot.slane %v53_v30, %v57_v29  ;;  %v62_v33 = vrot.slane %v53_v30, %v61_v31  ;;  %v299_v61 = vld [vmem:[%s2874_s1] sm:$0x3]  ;;  %v300_v16 = vld [vmem:[%s2874_s1 + $0xe] sm:$0x3] }
  0x18   :  { %142 = vmatprep.mubr.f32.mxu0 %v2164_v0  ;;  %198 = vmatpush1.msra.mxu1 %v2271_v19  ;;  %vm301_vm1 = vcmp.gt.f32.partialorder %v299_v61, 0.0  ;;  %vm302_vm2 = vcmp.gt.f32.partialorder %v300_v16, 0.0 }
  0x19   :  { %374 = vmatprep.subr.mxu0 %v2228_v4  ;;  %199 = vmatprep.subr.mxu1 %v2275_v20  ;;  %v303_v2 = vsel %vm301_vm1, 1, %v2165_v49  ;;  %v310_v27 = vsel %vm302_vm2, 1, %v2165_v49 }
  0x1a   :  { %375 = vmatpush1.msra.mxu0 %v2233_v6  ;;  %200 = vmatpush1.msra.mxu1 %v2282_v22 }
  0x1b   :  { %1918 = vmatmul.mubr.msk.f32.gmra.mxu0 %vm65_vm0, %v44_v21  ;;  %201 = vmatprep.subr.mxu1 %v2285_v23 }
  0x1c   :  { %376 = vmatprep.subr.mxu0 %v2239_v8  ;;  %202 = vmatpush1.msra.mxu1 %v2289_v24 }
  0x1d   :  { %377 = vmatpush1.msra.mxu0 %v2245_v10  ;;  %203 = vmatprep.subr.mxu1 %v2294_v25 }
  0x1e   :  { %378 = vmatprep.subr.mxu0 %v2247_v11  ;;  %204 = vmatpush1.msra.mxu1 %v2297_v26 }
  0x1f   :  { %379 = vmatpush1.msra.mxu0 %v2253_v13  ;;  %238 = vmatmul.mubr.f32.vlgmr.msra.gmra.mxu1 %v2164_v0 }
  0x20   :  { %380 = vmatprep.subr.mxu0 %v2259_v15  ;;  %422 = vmatprep.mubr.f32.mxu0 %v2164_v0 }
  0x21   :  { %381 = vmatpush1.msra.mxu0 %v2265_v17  ;;  %574 = vmatprep.subr.mxu1 %v2228_v4 }
  0x22   :  { %382 = vmatprep.subr.mxu0 %v2268_v18  ;;  %575 = vmatpush1.msra.mxu1 %v2233_v6 }
  0x23   :  { %383 = vmatpush1.msra.mxu0 %v2271_v19  ;;  %576 = vmatprep.subr.mxu1 %v2239_v8 }
  0x24   :  { %384 = vmatprep.subr.mxu0 %v2275_v20  ;;  %577 = vmatpush1.msra.mxu1 %v2245_v10 }
  0x25   :  { %385 = vmatpush1.msra.mxu0 %v2282_v22  ;;  %578 = vmatprep.subr.mxu1 %v2247_v11 }
  0x26   :  { %386 = vmatprep.subr.mxu0 %v2285_v23  ;;  %579 = vmatpush1.msra.mxu1 %v2253_v13 }
  0x27   :  { %387 = vmatpush1.msra.mxu0 %v2289_v24  ;;  %580 = vmatprep.subr.mxu1 %v2259_v15 }
  0x28   :  { %388 = vmatprep.subr.mxu0 %v2294_v25  ;;  %581 = vmatpush1.msra.mxu1 %v2265_v17 }
  0x29   :  { %389 = vmatpush1.msra.mxu0 %v2297_v26  ;;  %582 = vmatprep.subr.mxu1 %v2268_v18 }
  0x2a   :  { %622 = vmatprep.mubr.f32.mxu1 %v2164_v0  ;;  %583 = vmatpush1.msra.mxu1 %v2271_v19 }
  0x2b   :  { %773 = vmatprep.subr.mxu0 %v2228_v4  ;;  %584 = vmatprep.subr.mxu1 %v2275_v20 }
  0x2c   :  { %585 = vmatpush1.msra.mxu1 %v2282_v22  ;;  %1989 = vset.pattern.permute.xlu1 %v2165_v49 }
  0x2d   :  { %586 = vmatprep.subr.mxu1 %v2285_v23  ;;  %1990 = vset.pattern.permute.xlu0 %v2165_v49 }
  0x2e   :  { %587 = vmatpush1.msra.mxu1 %v2289_v24 }
  0x2f   :  { %588 = vmatprep.subr.mxu1 %v2294_v25 }
  0x30   :  { %589 = vmatpush1.msra.mxu1 %v2297_v26 }
  0x31   :  { %965 = vmatprep.subr.mxu1 %v2228_v4 }
  0xd7   :  { %v138_v34 = vpop.f32.mrf.mxu0 }
  0xd8   :  { %v139_v35 = vadd.f32 %v138_v34, %v58_v32 }
  0xd9   :  { %v140_v36 = vpop.f32.mrf.mxu0 }
  0xda   :  { %149 = vst [vmem:[#allocation2 + $0x10] sm:$0xff] %v139_v35  ;;  %v141_v37 = vadd.f32 %v140_v36, %v62_v33 }
  0xdb   :  { %v144_v38 = vpop.f32.mrf.mxu0 }
  0xdc   :  { %150 = vst [vmem:[#allocation2] sm:$0xff] %v141_v37  ;;  %v145_v39 = vadd.f32 %v144_v38, %v58_v32 }
  0xdd   :  { %v146_v40 = vpop.f32.mrf.mxu0 }
  0xde   :  { %151 = vst [vmem:[#allocation2 + $0x18] sm:$0xff] %v145_v39  ;;  %v147_v41 = vadd.f32 %v146_v40, %v62_v33 }
  0xdf   :  { %v239_v42 = vpop.f32.mrf.mxu1 }
  0xe0   :  { %152 = vst [vmem:[#allocation2 + $0x8] sm:$0xff] %v147_v41 }
  0xe1   :  { %v241_v43 = vpop.f32.mrf.mxu1  ;;  %v244_v45 = vld [vmem:[#allocation2 + $0x10] sm:$0x3] }
  0xe2   :  { %v248_v44 = vrot.slane %v241_v43, 2  ;;  %v245_v48 = vadd.f32 %v244_v45, %v239_v42  ;;  %v429_v45 = vld [vmem:[#allocation2 + $0x10] sm:$0xc] }
  0xe4   :  { %v1919_v53 = vmul.f32 -1.442695, %v245_v48 }
  0xe7   :  { %v246_v46 = vld [vmem:[#allocation2 + $0x8] sm:$0xc0] }
  0xe8   :  { %v250_v47 = vadd.f32 %v248_v44, %v246_v46 }
  0xea   :  { %1991 = vtanh.f32 %v250_v47  ;;  %v1920_v52 = vmul.f32 -1.442695, %v250_v47 }
  0xeb   :  { %1993 = vtanh.f32 %v245_v48 }
  0xec   :  { %1995 = vpow2.f32 %v1920_v52 }
  0xed   :  { %1997 = vpow2.f32 %v1919_v53 }
  0xf7   :  { %v1992_v50 = vpop.eup %1991 }
  0xf8   :  { %284 = vrot.lane.b32.xlu0 %v1992_v50, %s2166_s3  ;;  %v1994_v51 = vpop.eup %1993  ;;  %v434_v50 = vld [vmem:[#allocation2 + $0x8] sm:$0x30] }
  0xf9   :  { %v1996_v54 = vpop.eup %1995 }
  0xfa   :  { %v278_v55 = vadd.f32 1.0, %v1996_v54  ;;  %v1998_v56 = vpop.eup %1997 }
  0xfb   :  { %v254_v57 = vadd.f32 1.0, %v1998_v56 }
  0xfc   :  { %260 = vrot.lane.b32.xlu0 %v1994_v51, %s2166_s3  ;;  %1999 = vrcp.f32 %v278_v55 }
  0xfd   :  { %2001 = vrcp.f32 %v254_v57 }
 0x109   :  { %v2000_v58 = vpop.eup %1999 }
 0x10a   :  { %v2002_v62 = vpop.eup %2001  ;;  %v282_v3 = vmul.f32 0.0, %v2000_v58 }
 0x10b   :  { %v258_v9 = vmul.f32 0.0, %v2002_v62 }
 0x16a   :  { %v285_v59 = vpop.permute.xlu0 %284 }
 0x16b   :  { %v287_v60 = vmul.f32 %v2000_v58, %v285_v59 }
 0x16d   :  { %289 = vrot.lane.b32.xlu1 %v287_v60, %s2166_s3 }
 0x16e   :  { %v261_v63 = vpop.permute.xlu0 %260 }
 0x16f   :  { %v263_v1 = vmul.f32 %v2002_v62, %v261_v63  ;;  %v496_v63 = vld [vmem:[%s2874_s1 + $0xc] sm:$0x3] }
 0x170   :  { %vm498_vm6 = vcmp.gt.f32.partialorder %v496_v63, 0.0  ;;  %v634_v63 = vld [vmem:[#allocation2 + $0x8] sm:$0xc] }
 0x171   :  { %265 = vrot.lane.b32.xlu1 %v263_v1, %s2166_s3 }
 0x175   :  { %305 = vperm.xlu1 %1989, %v303_v2  }
 0x1df   :  { %v290_v5 = vpop.permute.xlu1 %289 }
 0x1e0   :  { %v292_v7 = vadd.f32 %v290_v5, %v282_v3 }
 0x1e2   :  { %2003 = vtanh.f32 %v292_v7  ;;  %v322_v36 = vrot.slane %v292_v7, 6 }
 0x1e3   :  { %v266_v12 = vpop.permute.xlu1 %265 }
 0x1e4   :  { %v2350_v14 = vadd.f32 %v266_v12, %v258_v9  ;;  %v519_v12 = vsel %vm498_vm6, 1, %v2165_v49 }
 0x1e6   :  { %2005 = vtanh.f32 %v2350_v14 }
 0x1ef   :  { %v2004_v21 = vpop.eup %2003 }
 0x1f0   :  { %295 = vrot.lane.b32.xlu0 %v2004_v21, %s2166_s3  ;;  %v2359_v29 = vpop.permute.xlu1 %305 }
 0x1f1   :  { %vm307_vm3 = vcmp.eq.s32.totalorder %v2359_v29, 1 }
 0x1f2   :  { %v2413_v16 = vsel %vm307_vm3, %v2350_v14, 0.0 }
 0x1f3   :  { %v2006_v28 = vpop.eup %2005 }
 0x1f4   :  { %271 = vrot.lane.b32.xlu1 %v2006_v28, %s2166_s3  ;;  %312 = vperm.xlu0 %1990, %v310_v27   ;;  %v447_v27 = vrot.slane %v2413_v16, 6 }
 0x262   :  { %v296_v30 = vpop.permute.xlu0 %295 }
 0x263   :  { %v298_v31 = vmul.f32 %v2000_v58, %v296_v30 }
 0x265   :  { %v316_v32 = vrot.slane %v298_v31, 6 }
 0x266   :  { %v272_v33 = vpop.permute.xlu1 %271 }
 0x267   :  { %v274_v34 = vmul.f32 %v2002_v62, %v272_v33  ;;  %317 = vrot.lane.b32.xlu1 %v316_v32, %s2167_s13 }
 0x269   :  { %v2365_v35 = vsel %vm307_vm3, %v274_v34, 0.0 }
 0x26a   :  { %347 = vrot.lane.b32.xlu0 %v2365_v35, %s2167_s13 }
 0x26e   :  { %323 = vrot.lane.b32.xlu0 %v322_v36, %s2168_s14 }
 0x26f   :  { %v313_v37 = vpop.permute.xlu0 %312 }
 0x270   :  { %vm314_vm4 = vcmp.eq.s32.totalorder %v313_v37, 1  ;;  %v495_v37 = vld [vmem:[%s2874_s1 + $0x2] sm:$0x3] }
 0x271   :  { %vm497_vm7 = vcmp.gt.f32.partialorder %v495_v37, 0.0 }
 0x272   :  { %v499_v29 = vsel %vm497_vm7, 1, %v2165_v49 }
 0x2d9   :  { %v318_v38 = vpop.permute.xlu1 %317 }
 0x2da   :  { %v2371_v39 = vsel %vm314_vm4, %v318_v38, 0.0 }
 0x2db   :  { %351 = vrot.lane.b32.xlu1 %v2371_v39, %s2166_s3 }
 0x2dc   :  { %v2375_v40 = vpop.permute.xlu0 %347 }
 0x2e0   :  { %v324_v53 = vpop.permute.xlu0 %323 }
 0x2e1   :  { %v2399_v55 = vsel %vm314_vm4, %v324_v53, 0.0 }
 0x2e2   :  { %v474_v56 = vrot.slane %v2399_v55, 4 }
 0x34d   :  { %v352_v41 = vpop.permute.xlu1 %351 }
 0x34e   :  { %v354_v42 = vsel %vm65_vm0, %v2375_v40, %v352_v41 }
 0x34f   :  { %1921 = vmatmul.mubr.msk.f32.vlgmr.msra.gmra.mxu0 %vm169_vm5, %v354_v42 }
 0x350   :  { %774 = vmatpush1.msra.mxu0 %v2233_v6  ;;  %821 = vmatprep.mubr.f32.mxu0 %v2164_v0 }
 0x351   :  { %775 = vmatprep.subr.mxu0 %v2239_v8 }
 0x352   :  { %776 = vmatpush1.msra.mxu0 %v2245_v10 }
 0x353   :  { %777 = vmatprep.subr.mxu0 %v2247_v11 }
 0x354   :  { %778 = vmatpush1.msra.mxu0 %v2253_v13 }
 0x355   :  { %779 = vmatprep.subr.mxu0 %v2259_v15 }
 0x356   :  { %780 = vmatpush1.msra.mxu0 %v2265_v17 }
 0x357   :  { %781 = vmatprep.subr.mxu0 %v2268_v18 }
 0x358   :  { %782 = vmatpush1.msra.mxu0 %v2271_v19 }
 0x359   :  { %783 = vmatprep.subr.mxu0 %v2275_v20 }
 0x35a   :  { %784 = vmatpush1.msra.mxu0 %v2282_v22 }
 0x35b   :  { %785 = vmatprep.subr.mxu0 %v2285_v23 }
 0x35c   :  { %786 = vmatpush1.msra.mxu0 %v2289_v24 }
 0x35d   :  { %787 = vmatprep.subr.mxu0 %v2294_v25 }
 0x35e   :  { %788 = vmatpush1.msra.mxu0 %v2297_v26 }
 0x35f   :  { %1166 = vmatprep.subr.mxu0 %v2228_v4 }
 0x40f   :  { %v424_v43 = vpop.f32.mrf.mxu0 }
 0x410   :  { %v431_v44 = vrot.slane %v424_v43, 6 }
 0x411   :  { %v426_v46 = vpop.f32.mrf.mxu0 }
 0x412   :  { %v433_v47 = vadd.f32 %v431_v44, %v429_v45  ;;  %v436_v48 = vrot.slane %v426_v46, 4 }
 0x414   :  { %2007 = vtanh.f32 %v433_v47  ;;  %v438_v51 = vadd.f32 %v436_v48, %v434_v50  ;;  %v1922_v57 = vmul.f32 -1.442695, %v433_v47 }
 0x416   :  { %2009 = vtanh.f32 %v438_v51  ;;  %v1923_v58 = vmul.f32 -1.442695, %v438_v51 }
 0x417   :  { %2011 = vpow2.f32 %v1922_v57 }
 0x418   :  { %2013 = vpow2.f32 %v1923_v58 }
 0x421   :  { %v2008_v52 = vpop.eup %2007 }
 0x422   :  { %451 = vrot.lane.b32.xlu0 %v2008_v52, %s2166_s3 }
 0x423   :  { %v2010_v54 = vpop.eup %2009 }
 0x424   :  { %480 = vrot.lane.b32.xlu1 %v2010_v54, %s2166_s3  ;;  %v2012_v59 = vpop.eup %2011 }
 0x425   :  { %v2014_v60 = vpop.eup %2013  ;;  %v442_v61 = vadd.f32 1.0, %v2012_v59  ;;  %v629_v59 = vld [vmem:[#allocation2 + $0x10] sm:$0x30] }
 0x426   :  { %v469_v62 = vadd.f32 1.0, %v2014_v60 }
 0x427   :  { %2015 = vrcp.f32 %v442_v61 }
 0x428   :  { %475 = vrot.lane.b32.xlu1 %v474_v56, %s2166_s3  ;;  %2017 = vrcp.f32 %v469_v62 }
 0x434   :  { %v2016_v1 = vpop.eup %2015 }
 0x435   :  { %v2018_v5 = vpop.eup %2017  ;;  %v449_v32 = vmul.f32 %v2016_v1, %v447_v27 }
 0x494   :  { %v452_v2 = vpop.permute.xlu0 %451 }
 0x495   :  { %v454_v3 = vmul.f32 %v2016_v1, %v452_v2 }
 0x496   :  { %v481_v7 = vpop.permute.xlu1 %480 }
 0x497   :  { %456 = vrot.lane.b32.xlu1 %v454_v3, %s2166_s3  ;;  %v483_v9 = vmul.f32 %v2018_v5, %v481_v7 }
 0x499   :  { %485 = vrot.lane.b32.xlu0 %v483_v9, %s2166_s3 }
 0x49a   :  { %v476_v21 = vpop.permute.xlu1 %475 }
 0x49b   :  { %521 = vperm.xlu1 %1989, %v519_v12   ;;  %v478_v28 = vmul.f32 %v2018_v5, %v476_v21 }
 0x509   :  { %v457_v30 = vpop.permute.xlu1 %456 }
 0x50a   :  { %v459_v34 = vadd.f32 %v457_v30, %v449_v32 }
 0x50b   :  { %v486_v31 = vpop.permute.xlu0 %485 }
 0x50c   :  { %v488_v33 = vadd.f32 %v486_v31, %v478_v28  ;;  %v511_v47 = vrot.slane %v459_v34, 2 }
 0x50e   :  { %2019 = vtanh.f32 %v488_v33  ;;  %v531_v46 = vrot.slane %v488_v33, 4 }
 0x50f   :  { %2021 = vtanh.f32 %v459_v34 }
 0x516   :  { %v522_v48 = vpop.permute.xlu1 %521 }
 0x517   :  { %vm523_vm8 = vcmp.eq.s32.totalorder %v522_v48, 1 }
 0x51b   :  { %v2020_v36 = vpop.eup %2019 }
 0x51c   :  { %491 = vrot.lane.b32.xlu0 %v2020_v36, %s2166_s3  ;;  %v2022_v14 = vpop.eup %2021 }
 0x520   :  { %462 = vrot.lane.b32.xlu0 %v2022_v14, %s2166_s3 }
 0x524   :  { %501 = vperm.xlu0 %1990, %v499_v29  }
 0x58e   :  { %v492_v38 = vpop.permute.xlu0 %491 }
 0x58f   :  { %v494_v41 = vmul.f32 %v2018_v5, %v492_v38 }
 0x591   :  { %v525_v42 = vrot.slane %v494_v41, 4 }
 0x592   :  { %v463_v43 = vpop.permute.xlu0 %462 }
 0x593   :  { %v465_v44 = vmul.f32 %v2016_v1, %v463_v43  ;;  %526 = vrot.lane.b32.xlu1 %v525_v42, %s2167_s13 }
 0x595   :  { %v505_v45 = vrot.slane %v465_v44, 2 }
 0x597   :  { %506 = vrot.lane.b32.xlu1 %v505_v45, %s2167_s13 }
 0x59b   :  { %532 = vrot.lane.b32.xlu1 %v531_v46, %s2168_s14 }
 0x59f   :  { %512 = vrot.lane.b32.xlu1 %v511_v47, %s2168_s14  ;;  %v2432_v52 = vpop.permute.xlu0 %501 }
 0x5a0   :  { %vm503_vm9 = vcmp.eq.s32.totalorder %v2432_v52, 1 }
 0x605   :  { %v527_v50 = vpop.permute.xlu1 %526 }
 0x606   :  { %v2428_v51 = vsel %vm523_vm8, %v527_v50, %v2371_v39 }
 0x607   :  { %551 = vrot.lane.b32.xlu0 %v2428_v51, %s2166_s3 }
 0x609   :  { %v507_v53 = vpop.permute.xlu1 %506 }
 0x60a   :  { %v2438_v54 = vsel %vm503_vm9, %v507_v53, %v2375_v40 }
 0x60d   :  { %v533_v5 = vpop.permute.xlu1 %532 }
 0x60e   :  { %v2464_v7 = vsel %vm523_vm8, %v533_v5, %v2399_v55 }
 0x60f   :  { %v676_v9 = vrot.slane %v2464_v7, 6 }
 0x611   :  { %v513_v32 = vpop.permute.xlu1 %512 }
 0x679   :  { %v552_v56 = vpop.permute.xlu0 %551 }
 0x67a   :  { %v554_v57 = vsel %vm65_vm0, %v2438_v54, %v552_v56  ;;  %v2483_v56 = vld [vmem:[%s2874_s1 + $0x4] sm:$0x3] }
 0x67b   :  { %1924 = vmatmul.mubr.msk.f32.vlgmr.msra.gmra.mxu1 %vm169_vm5, %v554_v57  ;;  %vm699_vm11 = vcmp.gt.f32.partialorder %v2483_v56, 0.0 }
 0x67c   :  { %966 = vmatpush1.msra.mxu1 %v2233_v6  ;;  %1013 = vmatprep.mubr.f32.mxu1 %v2164_v0 }
 0x67d   :  { %967 = vmatprep.subr.mxu1 %v2239_v8 }
 0x67e   :  { %968 = vmatpush1.msra.mxu1 %v2245_v10 }
 0x67f   :  { %969 = vmatprep.subr.mxu1 %v2247_v11 }
 0x680   :  { %970 = vmatpush1.msra.mxu1 %v2253_v13 }
 0x681   :  { %971 = vmatprep.subr.mxu1 %v2259_v15 }
 0x682   :  { %972 = vmatpush1.msra.mxu1 %v2265_v17 }
 0x683   :  { %973 = vmatprep.subr.mxu1 %v2268_v18 }
 0x684   :  { %974 = vmatpush1.msra.mxu1 %v2271_v19 }
 0x685   :  { %975 = vmatprep.subr.mxu1 %v2275_v20 }
 0x686   :  { %976 = vmatpush1.msra.mxu1 %v2282_v22 }
 0x687   :  { %977 = vmatprep.subr.mxu1 %v2285_v23 }
 0x688   :  { %978 = vmatpush1.msra.mxu1 %v2289_v24 }
 0x689   :  { %979 = vmatprep.subr.mxu1 %v2294_v25 }
 0x68a   :  { %980 = vmatpush1.msra.mxu1 %v2297_v26 }
 0x68b   :  { %1366 = vmatprep.subr.mxu1 %v2228_v4 }
 0x73b   :  { %v624_v40 = vpop.f32.mrf.mxu1 }
 0x73c   :  { %v631_v58 = vrot.slane %v624_v40, 4  ;;  %v701_v40 = vsel %vm699_vm11, 1, %v2165_v49 }
 0x73d   :  { %v626_v60 = vpop.f32.mrf.mxu1 }
 0x73e   :  { %v633_v61 = vadd.f32 %v631_v58, %v629_v59  ;;  %v636_v62 = vrot.slane %v626_v60, 6 }
 0x740   :  { %2023 = vtanh.f32 %v633_v61  ;;  %v638_v1 = vadd.f32 %v636_v62, %v634_v63  ;;  %v1925_v21 = vmul.f32 -1.442695, %v633_v61 }
 0x742   :  { %2025 = vtanh.f32 %v638_v1  ;;  %v1926_v12 = vmul.f32 -1.442695, %v638_v1 }
 0x744   :  { %2027 = vpow2.f32 %v1926_v12 }
 0x745   :  { %2029 = vpow2.f32 %v1925_v21 }
 0x74d   :  { %v2024_v2 = vpop.eup %2023 }
 0x74e   :  { %653 = vrot.lane.b32.xlu1 %v2024_v2, %s2166_s3 }
 0x74f   :  { %v2026_v3 = vpop.eup %2025 }
 0x750   :  { %682 = vrot.lane.b32.xlu0 %v2026_v3, %s2166_s3 }
 0x751   :  { %v2028_v27 = vpop.eup %2027 }
 0x752   :  { %v671_v28 = vadd.f32 1.0, %v2028_v27  ;;  %v2030_v30 = vpop.eup %2029 }
 0x753   :  { %v642_v31 = vadd.f32 1.0, %v2030_v30 }
 0x754   :  { %515 = vrot.lane.b32.xlu0 %v2413_v16, %s2168_s14  ;;  %2031 = vrcp.f32 %v671_v28  ;;  %v698_v16 = vld [vmem:[%s2874_s1 + $0xa] sm:$0x3] }
 0x755   :  { %2033 = vrcp.f32 %v642_v31  ;;  %vm700_vm10 = vcmp.gt.f32.partialorder %v698_v16, 0.0 }
 0x756   :  { %v718_v42 = vsel %vm700_vm10, 1, %v2165_v49 }
 0x758   :  { %677 = vrot.lane.b32.xlu0 %v676_v9, %s2166_s3 }
 0x761   :  { %v2032_v55 = vpop.eup %2031 }
 0x762   :  { %v2034_v37 = vpop.eup %2033 }
 0x7c0   :  { %v654_v36 = vpop.permute.xlu1 %653 }
 0x7c1   :  { %v656_v29 = vmul.f32 %v2034_v37, %v654_v36 }
 0x7c2   :  { %v683_v33 = vpop.permute.xlu0 %682 }
 0x7c3   :  { %v685_v34 = vmul.f32 %v2032_v55, %v683_v33 }
 0x7c5   :  { %687 = vrot.lane.b32.xlu1 %v685_v34, %s2166_s3 }
 0x7c6   :  { %v516_v14 = vpop.permute.xlu0 %515 }
 0x7c7   :  { %v518_v38 = vsel %vm503_vm9, %v513_v32, %v516_v14  ;;  %v2506_v32 = vld [vmem:[%s2874_s1 + $0x8] sm:$0x3]  ;;  %v828_v14 = vld [vmem:[#allocation2 + $0x10] sm:$0xc0] }
 0x7c8   :  { %v647_v41 = vrot.slane %v518_v38, 4  ;;  %vm895_vm14 = vcmp.gt.f32.partialorder %v2506_v32, 0.0 }
 0x7c9   :  { %658 = vrot.lane.b32.xlu1 %v656_v29, %s2166_s3  ;;  %v913_v34 = vsel %vm895_vm14, 1, %v2165_v49 }
 0x7ca   :  { %648 = vrot.lane.b32.xlu0 %v647_v41, %s2166_s3  ;;  %v678_v43 = vpop.permute.xlu0 %677  ;;  %v833_v41 = vld [vmem:[#allocation2 + $0x8] sm:$0x3] }
 0x7cb   :  { %v680_v44 = vmul.f32 %v2032_v55, %v678_v43 }
 0x7cd   :  { %720 = vperm.xlu1 %1989, %v718_v42  }
 0x837   :  { %v688_v45 = vpop.permute.xlu1 %687 }
 0x838   :  { %v690_v46 = vadd.f32 %v688_v45, %v680_v44 }
 0x83a   :  { %2035 = vtanh.f32 %v690_v46  ;;  %v730_v2 = vrot.slane %v690_v46, 2 }
 0x83b   :  { %v659_v50 = vpop.permute.xlu1 %658 }
 0x83c   :  { %v649_v47 = vpop.permute.xlu0 %648 }
 0x83d   :  { %v651_v48 = vmul.f32 %v2034_v37, %v649_v47 }
 0x83f   :  { %v661_v53 = vadd.f32 %v659_v50, %v651_v48 }
 0x841   :  { %2037 = vtanh.f32 %v661_v53  ;;  %v713_v1 = vrot.slane %v661_v53, 4 }
 0x847   :  { %v2036_v52 = vpop.eup %2035 }
 0x848   :  { %693 = vrot.lane.b32.xlu0 %v2036_v52, %s2166_s3  ;;  %v721_v3 = vpop.permute.xlu1 %720 }
 0x849   :  { %vm722_vm12 = vcmp.eq.s32.totalorder %v721_v3, 1 }
 0x84e   :  { %v2038_v57 = vpop.eup %2037 }
 0x84f   :  { %664 = vrot.lane.b32.xlu0 %v2038_v57, %s2166_s3 }
 0x853   :  { %703 = vperm.xlu0 %1990, %v701_v40  }
 0x8ba   :  { %v694_v58 = vpop.permute.xlu0 %693 }
 0x8bb   :  { %v696_v59 = vmul.f32 %v2032_v55, %v694_v58 }
 0x8bd   :  { %v724_v60 = vrot.slane %v696_v59, 2 }
 0x8bf   :  { %725 = vrot.lane.b32.xlu1 %v724_v60, %s2167_s13 }
 0x8c1   :  { %v665_v61 = vpop.permute.xlu0 %664 }
 0x8c2   :  { %v667_v62 = vmul.f32 %v2034_v37, %v665_v61 }
 0x8c4   :  { %v707_v63 = vrot.slane %v667_v62, 4 }
 0x8c6   :  { %708 = vrot.lane.b32.xlu1 %v707_v63, %s2167_s13 }
 0x8ca   :  { %714 = vrot.lane.b32.xlu1 %v713_v1, %s2168_s14 }
 0x8ce   :  { %731 = vrot.lane.b32.xlu1 %v730_v2, %s2168_s14  ;;  %v704_v12 = vpop.permute.xlu0 %703 }
 0x8cf   :  { %vm705_vm13 = vcmp.eq.s32.totalorder %v704_v12, 1 }
 0x931   :  { %v726_v5 = vpop.permute.xlu1 %725 }
 0x932   :  { %v2493_v9 = vsel %vm722_vm12, %v726_v5, %v2428_v51 }
 0x933   :  { %750 = vrot.lane.b32.xlu0 %v2493_v9, %s2166_s3 }
 0x938   :  { %v709_v21 = vpop.permute.xlu1 %708 }
 0x939   :  { %v2498_v27 = vsel %vm705_vm13, %v709_v21, %v2438_v54  ;;  %v2546_v21 = vld [vmem:[%s2874_s1 + $0x6] sm:$0x3] }
 0x93a   :  { %vm894_vm15 = vcmp.gt.f32.partialorder %v2546_v21, 0.0 }
 0x93c   :  { %v715_v28 = vpop.permute.xlu1 %714 }
 0x93d   :  { %v2500_v30 = vsel %vm705_vm13, %v715_v28, %v518_v38 }
 0x93e   :  { %v843_v31 = vrot.slane %v2500_v30, 2 }
 0x940   :  { %v732_v55 = vpop.permute.xlu1 %731  ;;  %844 = vrot.lane.b32.xlu1 %v843_v31, %s2166_s3  ;;  %v896_v31 = vsel %vm894_vm15, 1, %v2165_v49 }
 0x941   :  { %v734_v33 = vsel %vm722_vm12, %v732_v55, %v2464_v7 }
 0x944   :  { %872 = vrot.lane.b32.xlu1 %v734_v33, %s2166_s3 }
 0x948   :  { %915 = vperm.xlu1 %1989, %v913_v34  }
 0x9a5   :  { %v751_v36 = vpop.permute.xlu0 %750 }
 0x9a6   :  { %v753_v16 = vsel %vm65_vm0, %v2498_v27, %v751_v36 }
 0x9a7   :  { %1927 = vmatmul.mubr.msk.f32.vlgmr.msra.gmra.mxu0 %vm169_vm5, %v753_v16 }
 0x9a8   :  { %1167 = vmatpush1.msra.mxu0 %v2233_v6  ;;  %1214 = vmatprep.mubr.f32.mxu0 %v2164_v0 }
 0x9a9   :  { %1168 = vmatprep.subr.mxu0 %v2239_v8 }
 0x9aa   :  { %1169 = vmatpush1.msra.mxu0 %v2245_v10 }
 0x9ab   :  { %1170 = vmatprep.subr.mxu0 %v2247_v11 }
 0x9ac   :  { %1171 = vmatpush1.msra.mxu0 %v2253_v13 }
 0x9ad   :  { %1172 = vmatprep.subr.mxu0 %v2259_v15 }
 0x9ae   :  { %1173 = vmatpush1.msra.mxu0 %v2265_v17 }
 0x9af   :  { %1174 = vmatprep.subr.mxu0 %v2268_v18 }
 0x9b0   :  { %1175 = vmatpush1.msra.mxu0 %v2271_v19 }
 0x9b1   :  { %1176 = vmatprep.subr.mxu0 %v2275_v20 }
 0x9b2   :  { %1177 = vmatpush1.msra.mxu0 %v2282_v22  ;;  %v845_v60 = vpop.permute.xlu1 %844 }
 0x9b3   :  { %1178 = vmatprep.subr.mxu0 %v2285_v23 }
 0x9b4   :  { %1179 = vmatpush1.msra.mxu0 %v2289_v24 }
 0x9b5   :  { %1180 = vmatprep.subr.mxu0 %v2294_v25 }
 0x9b6   :  { %1181 = vmatpush1.msra.mxu0 %v2297_v26  ;;  %v2537_v1 = vpop.permute.xlu1 %872 }
 0x9b7   :  { %1565 = vmatprep.subr.mxu0 %v2228_v4 }
 0x9c3   :  { %v2554_v55 = vpop.permute.xlu1 %915 }
 0x9c4   :  { %vm917_vm1 = vcmp.eq.s32.totalorder %v2554_v55, 1 }
 0xa67   :  { %v823_v7 = vpop.f32.mrf.mxu0 }
 0xa68   :  { %v830_v37 = vrot.slane %v823_v7, 2 }
 0xa69   :  { %v825_v29 = vpop.f32.mrf.mxu0 }
 0xa6a   :  { %v832_v38 = vadd.f32 %v830_v37, %v828_v14  ;;  %v834_v42 = vadd.f32 %v833_v41, %v825_v29 }
 0xa6c   :  { %2039 = vtanh.f32 %v832_v38  ;;  %v1928_v45 = vmul.f32 -1.442695, %v832_v38  ;;  %v1929_v46 = vmul.f32 -1.442695, %v834_v42 }
 0xa6d   :  { %2041 = vtanh.f32 %v834_v42 }
 0xa6e   :  { %2043 = vpow2.f32 %v1928_v45 }
 0xa6f   :  { %2045 = vpow2.f32 %v1929_v46 }
 0xa79   :  { %v2040_v43 = vpop.eup %2039 }
 0xa7a   :  { %849 = vrot.lane.b32.xlu0 %v2040_v43, %s2166_s3  ;;  %v2042_v44 = vpop.eup %2041 }
 0xa7b   :  { %v2044_v4 = vpop.eup %2043 }
 0xa7c   :  { %v838_v47 = vadd.f32 1.0, %v2044_v4  ;;  %v2046_v48 = vpop.eup %2045 }
 0xa7d   :  { %v867_v50 = vadd.f32 1.0, %v2046_v48 }
 0xa7e   :  { %877 = vrot.lane.b32.xlu0 %v2042_v44, %s2166_s3  ;;  %2047 = vrcp.f32 %v838_v47 }
 0xa7f   :  { %2049 = vrcp.f32 %v867_v50  ;;  %v2596_v50 = vld [vmem:[%s2874_s1 + $0x8] sm:$0x3] }
 0xa80   :  { %vm1084_vm3 = vcmp.gt.f32.partialorder %v2596_v50, 0.0 }
 0xa8b   :  { %v2048_v53 = vpop.eup %2047 }
 0xa8c   :  { %v2050_v40 = vpop.eup %2049  ;;  %v847_v61 = vmul.f32 %v2048_v53, %v845_v60 }
 0xa8d   :  { %v875_v2 = vmul.f32 %v2050_v40, %v2537_v1 }
 0xaec   :  { %v850_v52 = vpop.permute.xlu0 %849 }
 0xaed   :  { %v852_v57 = vmul.f32 %v2048_v53, %v850_v52 }
 0xaef   :  { %854 = vrot.lane.b32.xlu0 %v852_v57, %s2166_s3  ;;  %v1086_v57 = vsel %vm1084_vm3, 1, %v2165_v49  ;;  %vm337_vm3 = vcmask 254976  }
 0xaf0   :  { %v878_v58 = vpop.permute.xlu0 %877 }
 0xaf1   :  { %v880_v59 = vmul.f32 %v2050_v40, %v878_v58 }
 0xaf3   :  { %882 = vrot.lane.b32.xlu0 %v880_v59, %s2166_s3 }
 0xb61   :  { %v855_v62 = vpop.permute.xlu0 %854 }
 0xb62   :  { %v857_v63 = vadd.f32 %v855_v62, %v847_v61 }
 0xb64   :  { %2051 = vtanh.f32 %v857_v63  ;;  %v908_v29 = vrot.slane %v857_v63, 6 }
 0xb65   :  { %v883_v3 = vpop.permute.xlu0 %882 }
 0xb66   :  { %v2540_v5 = vadd.f32 %v883_v3, %v875_v2 }
 0xb68   :  { %2053 = vtanh.f32 %v2540_v5 }
 0xb71   :  { %v2052_v12 = vpop.eup %2051 }
 0xb72   :  { %860 = vrot.lane.b32.xlu0 %v2052_v12, %s2166_s3  ;;  %v2615_v12 = vld [vmem:[%s2874_s1 + $0x6] sm:$0x3] }
 0xb73   :  { %vm1085_vm4 = vcmp.gt.f32.partialorder %v2615_v12, 0.0 }
 0xb75   :  { %v2054_v28 = vpop.eup %2053 }
 0xb76   :  { %918 = vrot.lane.b32.xlu0 %v2493_v9, %s2167_s13  ;;  %888 = vrot.lane.b32.xlu1 %v2054_v28, %s2166_s3 }
 0xb7a   :  { %898 = vperm.xlu1 %1989, %v896_v31  }
 0xbe4   :  { %v861_v33 = vpop.permute.xlu0 %860 }
 0xbe5   :  { %v863_v34 = vmul.f32 %v2048_v53, %v861_v33 }
 0xbe7   :  { %v902_v36 = vrot.slane %v863_v34, 6 }
 0xbe8   :  { %v889_v16 = vpop.permute.xlu1 %888  ;;  %v919_v37 = vpop.permute.xlu0 %918 }
 0xbe9   :  { %v891_v7 = vmul.f32 %v2050_v40, %v889_v16  ;;  %903 = vrot.lane.b32.xlu0 %v902_v36, %s2167_s13  ;;  %v922_v40 = vsel %vm917_vm1, %v2540_v5, %v2537_v1  ;;  %v1097_v5 = vsel %vm1085_vm4, 1, %v2165_v49 }
 0xbea   :  { %v1063_v58 = vrot.slane %v922_v40, 2 }
 0xbeb   :  { %v2560_v14 = vsel %vm917_vm1, %v891_v7, %v919_v37 }
 0xbec   :  { %942 = vrot.lane.b32.xlu1 %v2560_v14, %s2168_s14 }
 0xbf0   :  { %909 = vrot.lane.b32.xlu1 %v908_v29, %s2168_s14 }
 0xbf5   :  { %v899_v38 = vpop.permute.xlu1 %898 }
 0xbf6   :  { %vm900_vm2 = vcmp.eq.s32.totalorder %v899_v38, 1 }
 0xc5b   :  { %v904_v41 = vpop.permute.xlu0 %903 }
 0xc5c   :  { %v2567_v42 = vsel %vm900_vm2, %v904_v41, %v2498_v27 }
 0xc5e   :  { %v943_v43 = vpop.permute.xlu1 %942 }
 0xc5f   :  { %v945_v44 = vsel %vm65_vm0, %v2567_v42, %v943_v43 }
 0xc60   :  { %1930 = vmatmul.mubr.msk.f32.vlgmr.msra.gmra.mxu1 %vm169_vm5, %v945_v44 }
 0xc61   :  { %1367 = vmatpush1.msra.mxu1 %v2233_v6  ;;  %1414 = vmatprep.mubr.f32.mxu1 %v2164_v0 }
 0xc62   :  { %1368 = vmatprep.subr.mxu1 %v2239_v8 }
 0xc63   :  { %1369 = vmatpush1.msra.mxu1 %v2245_v10 }
 0xc64   :  { %1370 = vmatprep.subr.mxu1 %v2247_v11  ;;  %v1022_v11 = vld [vmem:[#allocation2] sm:$0xc0] }
 0xc65   :  { %1371 = vmatpush1.msra.mxu1 %v2253_v13 }
 0xc66   :  { %1372 = vmatprep.subr.mxu1 %v2259_v15  ;;  %v1020_v15 = vld [vmem:[#allocation2 + $0x18] sm:$0x3] }
 0xc67   :  { %1373 = vmatpush1.msra.mxu1 %v2265_v17 }
 0xc68   :  { %1374 = vmatprep.subr.mxu1 %v2268_v18 }
 0xc69   :  { %1375 = vmatpush1.msra.mxu1 %v2271_v19 }
 0xc6a   :  { %1376 = vmatprep.subr.mxu1 %v2275_v20  ;;  %v910_v20 = vpop.permute.xlu1 %909 }
 0xc6b   :  { %1377 = vmatpush1.msra.mxu1 %v2282_v22  ;;  %v912_v22 = vsel %vm900_vm2, %v910_v20, %v2500_v30  ;;  %v2125_v20 = vld [vmem:[#allocation5 + $0x40] sm:$0xff] }
 0xc6c   :  { %1378 = vmatprep.subr.mxu1 %v2285_v23 }
 0xc6d   :  { %1379 = vmatpush1.msra.mxu1 %v2289_v24 }
 0xc6e   :  { %1380 = vmatprep.subr.mxu1 %v2294_v25 }
 0xc6f   :  { %1381 = vmatpush1.msra.mxu1 %v2297_v26 }
 0xd20   :  { %v1015_v6 = vpop.f32.mrf.mxu1 }
 0xd21   :  { %v1021_v17 = vadd.f32 %v1020_v15, %v1015_v6  ;;  %v2121_v15 = vld [vmem:[#allocation5 + $0x60] sm:$0xff] }
 0xd22   :  { %v1017_v8 = vpop.f32.mrf.mxu1 }
 0xd23   :  { %v1024_v10 = vrot.slane %v1017_v8, 2  ;;  %v1931_v24 = vmul.f32 -1.442695, %v1021_v17 }
 0xd25   :  { %v1026_v13 = vadd.f32 %v1024_v10, %v1022_v11  ;;  %v2119_v11 = vld [vmem:[#allocation5 + $0x70] sm:$0xff] }
 0xd27   :  { %2055 = vtanh.f32 %v1026_v13  ;;  %v1932_v23 = vmul.f32 -1.442695, %v1026_v13  ;;  %v2120_v13 = vld [vmem:[#allocation5 + $0x68] sm:$0xff] }
 0xd28   :  { %2057 = vtanh.f32 %v1021_v17  ;;  %v2122_v17 = vld [vmem:[#allocation5 + $0x58] sm:$0xff] }
 0xd29   :  { %2059 = vpow2.f32 %v1932_v23  ;;  %v2127_v23 = vld [vmem:[#allocation5 + $0x30] sm:$0xff] }
 0xd2a   :  { %2061 = vpow2.f32 %v1931_v24  ;;  %v2128_v24 = vld [vmem:[#allocation5 + $0x28] sm:$0xff] }
 0xd34   :  { %v2056_v18 = vpop.eup %2055 }
 0xd35   :  { %1067 = vrot.lane.b32.xlu0 %v2056_v18, %s2166_s3  ;;  %v2058_v19 = vpop.eup %2057  ;;  %v2123_v18 = vld [vmem:[#allocation5 + $0x50] sm:$0xff] }
 0xd36   :  { %v2060_v25 = vpop.eup %2059 }
 0xd37   :  { %v1058_v26 = vadd.f32 1.0, %v2060_v25  ;;  %v2062_v45 = vpop.eup %2061  ;;  %v2129_v25 = vld [vmem:[#allocation5 + $0x20] sm:$0xff] }
 0xd38   :  { %v1030_v46 = vadd.f32 1.0, %v2062_v45  ;;  %v2132_v45 = vld [vmem:[#allocation5 + $0x8] sm:$0xff] }
 0xd39   :  { %1040 = vrot.lane.b32.xlu0 %v2058_v19, %s2166_s3  ;;  %2063 = vrcp.f32 %v1058_v26  ;;  %v2124_v19 = vld [vmem:[#allocation5 + $0x48] sm:$0xff]  ;;  %v2131_v26 = vld [vmem:[#allocation5 + $0x10] sm:$0xff] }
 0xd3a   :  { %2065 = vrcp.f32 %v1030_v46  ;;  %v2133_v46 = vld [vmem:[#allocation5] sm:$0xff] }
 0xd3d   :  { %1035 = vrot.lane.b32.xlu0 %v912_v22, %s2166_s3  ;;  %v2126_v22 = vld [vmem:[#allocation5 + $0x38] sm:$0xff] }
 0xd46   :  { %v2064_v4 = vpop.eup %2063 }
 0xd47   :  { %v2066_v30 = vpop.eup %2065  ;;  %v1065_v59 = vmul.f32 %v2064_v4, %v1063_v58 }
 0xda7   :  { %v1068_v47 = vpop.permute.xlu0 %1067 }
 0xda8   :  { %v1070_v48 = vmul.f32 %v2064_v4, %v1068_v47 }
 0xdaa   :  { %1072 = vrot.lane.b32.xlu1 %v1070_v48, %s2166_s3  ;;  %v1221_v48 = vld [vmem:[#allocation2 + $0x18] sm:$0xc] }
 0xdab   :  { %v1041_v53 = vpop.permute.xlu0 %1040 }
 0xdac   :  { %v1043_v52 = vmul.f32 %v2066_v30, %v1041_v53 }
 0xdae   :  { %1045 = vrot.lane.b32.xlu1 %v1043_v52, %s2166_s3 }
 0xdaf   :  { %v2606_v60 = vpop.permute.xlu0 %1035 }
 0xdb0   :  { %v1038_v63 = vmul.f32 %v2066_v30, %v2606_v60 }
 0xdb2   :  { %1088 = vperm.xlu1 %1989, %v1086_v57   ;;  %v1226_v57 = vld [vmem:[#allocation2] sm:$0x30] }
 0xe1c   :  { %v1073_v61 = vpop.permute.xlu1 %1072 }
 0xe1d   :  { %v1075_v62 = vadd.f32 %v1073_v61, %v1065_v59 }
 0xe1f   :  { %2067 = vtanh.f32 %v1075_v62  ;;  %v1112_v38 = vrot.slane %v1075_v62, 6 }
 0xe20   :  { %v1046_v2 = vpop.permute.xlu1 %1045 }
 0xe21   :  { %v2609_v3 = vadd.f32 %v1046_v2, %v1038_v63 }
 0xe23   :  { %2069 = vtanh.f32 %v2609_v3 }
 0xe2c   :  { %v2068_v1 = vpop.eup %2067 }
 0xe2d   :  { %1078 = vrot.lane.b32.xlu0 %v2068_v1, %s2166_s3  ;;  %v2626_v34 = vpop.permute.xlu1 %1088 }
 0xe2e   :  { %vm1090_vm6 = vcmp.eq.s32.totalorder %v2626_v34, 1 }
 0xe30   :  { %v2070_v28 = vpop.eup %2069 }
 0xe31   :  { %1099 = vperm.xlu0 %1990, %v1097_v5   ;;  %1051 = vrot.lane.b32.xlu1 %v2070_v28, %s2166_s3 }
 0xe35   :  { %1092 = vrot.lane.b32.xlu0 %v2567_v42, %s2167_s13 }
 0xe39   :  { %1107 = vrot.lane.b32.xlu0 %v2560_v14, %s2167_s13 }
 0xe9f   :  { %v1079_v31 = vpop.permute.xlu0 %1078 }
 0xea0   :  { %v1081_v55 = vmul.f32 %v2064_v4, %v1079_v31 }
 0xea2   :  { %v1103_v33 = vrot.slane %v1081_v55, 6 }
 0xea3   :  { %v1052_v36 = vpop.permute.xlu1 %1051 }
 0xea4   :  { %1104 = vrot.lane.b32.xlu1 %v1103_v33, %s2167_s13  ;;  %v1054_v7 = vmul.f32 %v2066_v30, %v1052_v36  ;;  %v2663_v36 = vld [vmem:[%s2874_s1 + $0x4] sm:$0x3] }
 0xea5   :  { %vm1290_vm8 = vcmp.gt.f32.partialorder %v2663_v36, 0.0 }
 0xeac   :  { %v2628_v16 = vpop.permute.xlu0 %1099 }
 0xead   :  { %vm1101_vm7 = vcmp.eq.s32.totalorder %v2628_v16, 1 }
 0xeb0   :  { %v1093_v37 = vpop.permute.xlu0 %1092 }
 0xeb1   :  { %v2633_v29 = vsel %vm1090_vm6, %v1054_v7, %v1093_v37 }
 0xeb2   :  { %1139 = vrot.lane.b32.xlu1 %v2633_v29, %s2167_s13 }
 0xeb4   :  { %v1108_v41 = vpop.permute.xlu0 %1107 }
 0xeb6   :  { %1113 = vrot.lane.b32.xlu1 %v1112_v38, %s2168_s14 }
 0xf16   :  { %v1105_v43 = vpop.permute.xlu1 %1104 }
 0xf17   :  { %v2641_v44 = vsel %vm1101_vm7, %v1105_v43, %v1108_v41 }
 0xf18   :  { %1143 = vrot.lane.b32.xlu0 %v2641_v44, %s2166_s3 }
 0xf1c   :  { %1116 = vrot.lane.b32.xlu0 %v922_v40, %s2168_s14 }
 0xf24   :  { %v2646_v6 = vpop.permute.xlu1 %1139 }
 0xf28   :  { %v1114_v61 = vpop.permute.xlu1 %1113 }
 0xf8a   :  { %v1144_v8 = vpop.permute.xlu0 %1143 }
 0xf8b   :  { %v1146_v10 = vsel %vm65_vm0, %v2646_v6, %v1144_v8  ;;  %v1311_v8 = vsel %vm1290_vm8, 1, %v2165_v49 }
 0xf8c   :  { %1933 = vmatmul.mubr.msk.f32.vlgmr.msra.gmra.mxu0 %vm169_vm5, %v1146_v10  ;;  %v1096_v10 = vsel %vm1090_vm6, %v2609_v3, %v2606_v60  ;;  %vm1909_vm6 = vcmask 64512  }
 0xf8d   :  { %1566 = vmatpush1.msra.mxu0 %v2119_v11  ;;  %1613 = vmatprep.mubr.f32.mxu0 %v2164_v0  ;;  %v2130_v0 = vld [vmem:[#allocation5 + $0x18] sm:$0xff] }
 0xf8e   :  { %1567 = vmatprep.subr.mxu0 %v2120_v13  ;;  %v1117_v59 = vpop.permute.xlu0 %1116  ;;  %v1239_v13 = vrot.slane %v1096_v10, 6 }
 0xf8f   :  { %1568 = vmatpush1.msra.mxu0 %v2121_v15  ;;  %v2655_v63 = vsel %vm1101_vm7, %v1114_v61, %v1117_v59 }
 0xf90   :  { %1569 = vmatprep.subr.mxu0 %v2122_v17  ;;  %v1266_v2 = vrot.slane %v2655_v63, 4 }
 0xf91   :  { %1570 = vmatpush1.msra.mxu0 %v2123_v18 }
 0xf92   :  { %1571 = vmatprep.subr.mxu0 %v2124_v19 }
 0xf93   :  { %1572 = vmatpush1.msra.mxu0 %v2125_v20 }
 0xf94   :  { %1573 = vmatprep.subr.mxu0 %v2126_v22 }
 0xf95   :  { %1574 = vmatpush1.msra.mxu0 %v2127_v23 }
 0xf96   :  { %1575 = vmatprep.subr.mxu0 %v2128_v24  ;;  %v2676_v24 = vld [vmem:[%s2874_s1 + $0xa] sm:$0x3] }
 0xf97   :  { %1576 = vmatpush1.msra.mxu0 %v2129_v25  ;;  %vm1289_vm9 = vcmp.gt.f32.partialorder %v2676_v24, 0.0 }
 0xf98   :  { %1577 = vmatprep.subr.mxu0 %v2130_v0  ;;  %v1291_v3 = vsel %vm1289_vm9, 1, %v2165_v49 }
 0xf99   :  { %1578 = vmatpush1.msra.mxu0 %v2131_v26 }
 0xf9a   :  { %1579 = vmatprep.subr.mxu0 %v2132_v45 }
 0xf9b   :  { %1580 = vmatpush1.msra.mxu0 %v2133_v46 }
0x104c   :  { %v1216_v4 = vpop.f32.mrf.mxu0 }
0x104d   :  { %v1223_v47 = vrot.slane %v1216_v4, 6 }
0x104e   :  { %v1218_v30 = vpop.f32.mrf.mxu0 }
0x104f   :  { %v1225_v53 = vadd.f32 %v1223_v47, %v1221_v48  ;;  %v1228_v52 = vrot.slane %v1218_v30, 4 }
0x1051   :  { %2071 = vtanh.f32 %v1225_v53  ;;  %v1230_v40 = vadd.f32 %v1228_v52, %v1226_v57  ;;  %v1934_v1 = vmul.f32 -1.442695, %v1225_v53 }
0x1053   :  { %2073 = vtanh.f32 %v1230_v40  ;;  %v1935_v5 = vmul.f32 -1.442695, %v1230_v40 }
0x1054   :  { %2075 = vpow2.f32 %v1934_v1 }
0x1055   :  { %2077 = vpow2.f32 %v1935_v5 }
0x105e   :  { %v2072_v58 = vpop.eup %2071 }
0x105f   :  { %1243 = vrot.lane.b32.xlu0 %v2072_v58, %s2166_s3 }
0x1060   :  { %v2074_v62 = vpop.eup %2073 }
0x1061   :  { %1272 = vrot.lane.b32.xlu1 %v2074_v62, %s2166_s3  ;;  %v2076_v28 = vpop.eup %2075 }
0x1062   :  { %v2078_v31 = vpop.eup %2077  ;;  %v1234_v55 = vadd.f32 1.0, %v2076_v28 }
0x1063   :  { %v1261_v33 = vadd.f32 1.0, %v2078_v31  ;;  %v1426_v31 = vld [vmem:[#allocation2] sm:$0xc] }
0x1064   :  { %2079 = vrcp.f32 %v1234_v55 }
0x1065   :  { %1267 = vrot.lane.b32.xlu1 %v1266_v2, %s2166_s3  ;;  %2081 = vrcp.f32 %v1261_v33  ;;  %v1421_v2 = vld [vmem:[#allocation2 + $0x18] sm:$0x30] }
0x1071   :  { %v2080_v16 = vpop.eup %2079 }
0x1072   :  { %v2082_v38 = vpop.eup %2081  ;;  %v1241_v19 = vmul.f32 %v2080_v16, %v1239_v13 }
0x10d1   :  { %v1244_v7 = vpop.permute.xlu0 %1243 }
0x10d2   :  { %v1246_v37 = vmul.f32 %v2080_v16, %v1244_v7 }
0x10d3   :  { %v1273_v41 = vpop.permute.xlu1 %1272 }
0x10d4   :  { %1248 = vrot.lane.b32.xlu1 %v1246_v37, %s2166_s3  ;;  %v1275_v43 = vmul.f32 %v2082_v38, %v1273_v41 }
0x10d6   :  { %1277 = vrot.lane.b32.xlu0 %v1275_v43, %s2166_s3 }
0x10d7   :  { %v1268_v11 = vpop.permute.xlu1 %1267 }
0x10d8   :  { %1313 = vperm.xlu1 %1989, %v1311_v8   ;;  %v1270_v15 = vmul.f32 %v2082_v38, %v1268_v11 }
0x1146   :  { %v1249_v17 = vpop.permute.xlu1 %1248 }
0x1147   :  { %v1251_v22 = vadd.f32 %v1249_v17, %v1241_v19 }
0x1148   :  { %v1278_v18 = vpop.permute.xlu0 %1277 }
0x1149   :  { %v1280_v20 = vadd.f32 %v1278_v18, %v1270_v15  ;;  %v1303_v47 = vrot.slane %v1251_v22, 2 }
0x114b   :  { %2083 = vtanh.f32 %v1280_v20  ;;  %v1323_v4 = vrot.slane %v1280_v20, 4 }
0x114c   :  { %2085 = vtanh.f32 %v1251_v22 }
0x1153   :  { %v1314_v48 = vpop.permute.xlu1 %1313 }
0x1154   :  { %vm1315_vm10 = vcmp.eq.s32.totalorder %v1314_v48, 1 }
0x1158   :  { %v2084_v23 = vpop.eup %2083 }
0x1159   :  { %1283 = vrot.lane.b32.xlu0 %v2084_v23, %s2166_s3  ;;  %v2086_v60 = vpop.eup %2085 }
0x115d   :  { %1254 = vrot.lane.b32.xlu0 %v2086_v60, %s2166_s3 }
0x1161   :  { %1293 = vperm.xlu0 %1990, %v1291_v3  }
0x11cb   :  { %v1284_v34 = vpop.permute.xlu0 %1283 }
0x11cc   :  { %v1286_v25 = vmul.f32 %v2082_v38, %v1284_v34 }
0x11ce   :  { %v1317_v0 = vrot.slane %v1286_v25, 4 }
0x11cf   :  { %v1255_v26 = vpop.permute.xlu0 %1254 }
0x11d0   :  { %v1257_v45 = vmul.f32 %v2080_v16, %v1255_v26  ;;  %1318 = vrot.lane.b32.xlu1 %v1317_v0, %s2167_s13 }
0x11d2   :  { %v1297_v46 = vrot.slane %v1257_v45, 2 }
0x11d4   :  { %1298 = vrot.lane.b32.xlu1 %v1297_v46, %s2167_s13 }
0x11d8   :  { %1324 = vrot.lane.b32.xlu1 %v1323_v4, %s2168_s14 }
0x11dc   :  { %1304 = vrot.lane.b32.xlu1 %v1303_v47, %s2168_s14  ;;  %v1294_v52 = vpop.permute.xlu0 %1293 }
0x11dd   :  { %vm1295_vm11 = vcmp.eq.s32.totalorder %v1294_v52, 1  ;;  %v2723_v52 = vld [vmem:[%s2874_s1 + $0xc] sm:$0x3] }
0x11de   :  { %vm1491_vm13 = vcmp.gt.f32.partialorder %v2723_v52, 0.0 }
0x1242   :  { %v1319_v30 = vpop.permute.xlu1 %1318 }
0x1243   :  { %v2688_v53 = vsel %vm1315_vm10, %v1319_v30, %v2641_v44 }
0x1244   :  { %1343 = vrot.lane.b32.xlu0 %v2688_v53, %s2166_s3 }
0x1246   :  { %v1299_v57 = vpop.permute.xlu1 %1298 }
0x1247   :  { %v2694_v40 = vsel %vm1295_vm11, %v1299_v57, %v2646_v6 }
0x124a   :  { %v1325_v16 = vpop.permute.xlu1 %1324 }
0x124b   :  { %v2703_v7 = vsel %vm1315_vm10, %v1325_v16, %v2655_v63 }
0x124c   :  { %v1468_v37 = vrot.slane %v2703_v7, 6 }
0x124e   :  { %v1305_v15 = vpop.permute.xlu1 %1304 }
0x12b6   :  { %v1344_v58 = vpop.permute.xlu0 %1343 }
0x12b7   :  { %v1346_v59 = vsel %vm65_vm0, %v2694_v40, %v1344_v58  ;;  %v1493_v58 = vsel %vm1491_vm13, 1, %v2165_v49 }
0x12b8   :  { %1936 = vmatmul.mubr.msk.f32.vlgmr.msra.gmra.mxu1 %vm169_vm5, %v1346_v59 }
0x1378   :  { %v1416_v61 = vpop.f32.mrf.mxu1 }
0x1379   :  { %v1423_v62 = vrot.slane %v1416_v61, 4 }
0x137a   :  { %v1418_v1 = vpop.f32.mrf.mxu1 }
0x137b   :  { %v1425_v5 = vadd.f32 %v1423_v62, %v1421_v2  ;;  %v1428_v28 = vrot.slane %v1418_v1, 6 }
0x137d   :  { %2087 = vtanh.f32 %v1425_v5  ;;  %v1430_v55 = vadd.f32 %v1428_v28, %v1426_v31  ;;  %v1937_v41 = vmul.f32 -1.442695, %v1425_v5 }
0x137f   :  { %2089 = vtanh.f32 %v1430_v55  ;;  %v1938_v38 = vmul.f32 -1.442695, %v1430_v55 }
0x1381   :  { %2091 = vpow2.f32 %v1938_v38 }
0x1382   :  { %2093 = vpow2.f32 %v1937_v41 }
0x138a   :  { %v2088_v33 = vpop.eup %2087 }
0x138b   :  { %1445 = vrot.lane.b32.xlu1 %v2088_v33, %s2166_s3 }
0x138c   :  { %v2090_v6 = vpop.eup %2089 }
0x138d   :  { %1474 = vrot.lane.b32.xlu0 %v2090_v6, %s2166_s3 }
0x138e   :  { %v2092_v43 = vpop.eup %2091 }
0x138f   :  { %v1463_v8 = vadd.f32 1.0, %v2092_v43  ;;  %v2094_v11 = vpop.eup %2093 }
0x1390   :  { %v1434_v13 = vadd.f32 1.0, %v2094_v11 }
0x1391   :  { %1307 = vrot.lane.b32.xlu0 %v1096_v10, %s2168_s14  ;;  %2095 = vrcp.f32 %v1463_v8  ;;  %v2711_v10 = vld [vmem:[%s2874_s1 + $0x2] sm:$0x3] }
0x1392   :  { %2097 = vrcp.f32 %v1434_v13  ;;  %vm1492_vm12 = vcmp.gt.f32.partialorder %v2711_v10, 0.0  ;;  %v1620_v13 = vld [vmem:[#allocation2 + $0x18] sm:$0xc0] }
0x1393   :  { %v1510_v34 = vsel %vm1492_vm12, 1, %v2165_v49 }
0x1395   :  { %1469 = vrot.lane.b32.xlu0 %v1468_v37, %s2166_s3 }
0x139e   :  { %v2096_v17 = vpop.eup %2095 }
0x139f   :  { %v2098_v20 = vpop.eup %2097 }
0x13fd   :  { %v1446_v19 = vpop.permute.xlu1 %1445 }
0x13fe   :  { %v1448_v23 = vmul.f32 %v2098_v20, %v1446_v19 }
0x13ff   :  { %v1475_v63 = vpop.permute.xlu0 %1474 }
0x1400   :  { %v1477_v18 = vmul.f32 %v2096_v17, %v1475_v63 }
0x1402   :  { %1479 = vrot.lane.b32.xlu1 %v1477_v18, %s2166_s3 }
0x1403   :  { %v1308_v22 = vpop.permute.xlu0 %1307 }
0x1404   :  { %v1310_v60 = vsel %vm1295_vm11, %v1305_v15, %v1308_v22 }
0x1405   :  { %v1439_v3 = vrot.slane %v1310_v60, 4 }
0x1406   :  { %1450 = vrot.lane.b32.xlu1 %v1448_v23, %s2166_s3 }
0x1407   :  { %1440 = vrot.lane.b32.xlu0 %v1439_v3, %s2166_s3  ;;  %v1470_v25 = vpop.permute.xlu0 %1469 }
0x1408   :  { %v1472_v0 = vmul.f32 %v2096_v17, %v1470_v25 }
0x140a   :  { %1512 = vperm.xlu1 %1989, %v1510_v34  }
0x1474   :  { %v1480_v26 = vpop.permute.xlu1 %1479 }
0x1475   :  { %v1482_v45 = vadd.f32 %v1480_v26, %v1472_v0 }
0x1477   :  { %2099 = vtanh.f32 %v1482_v45  ;;  %v1522_v6 = vrot.slane %v1482_v45, 2 }
0x1478   :  { %v1451_v47 = vpop.permute.xlu1 %1450 }
0x1479   :  { %v1441_v46 = vpop.permute.xlu0 %1440 }
0x147a   :  { %v1443_v4 = vmul.f32 %v2098_v20, %v1441_v46 }
0x147c   :  { %v1453_v48 = vadd.f32 %v1451_v47, %v1443_v4  ;;  %v1685_v47 = vld [vmem:[%s2874_s1] sm:$0x3] }
0x147e   :  { %2101 = vtanh.f32 %v1453_v48  ;;  %v1505_v28 = vrot.slane %v1453_v48, 4 }
0x1484   :  { %v2100_v30 = vpop.eup %2099 }
0x1485   :  { %1485 = vrot.lane.b32.xlu0 %v2100_v30, %s2166_s3  ;;  %v1513_v31 = vpop.permute.xlu1 %1512 }
0x1486   :  { %vm1514_vm14 = vcmp.eq.s32.totalorder %v1513_v31, 1 }
0x148b   :  { %v2102_v57 = vpop.eup %2101 }
0x148c   :  { %1456 = vrot.lane.b32.xlu0 %v2102_v57, %s2166_s3 }
0x1490   :  { %1495 = vperm.xlu0 %1990, %v1493_v58  }
0x14f7   :  { %v1486_v59 = vpop.permute.xlu0 %1485 }
0x14f8   :  { %v1488_v61 = vmul.f32 %v2096_v17, %v1486_v59  ;;  %v1625_v17 = vld [vmem:[#allocation2] sm:$0x3] }
0x14fa   :  { %v1516_v62 = vrot.slane %v1488_v61, 2 }
0x14fc   :  { %1517 = vrot.lane.b32.xlu1 %v1516_v62, %s2167_s13  ;;  %v2134_v62 = vld [vmem:[%s2874_s1] sm:$0x3] }
0x14fe   :  { %v1457_v2 = vpop.permute.xlu0 %1456 }
0x14ff   :  { %v1459_v1 = vmul.f32 %v2098_v20, %v1457_v2 }
0x1501   :  { %v1499_v5 = vrot.slane %v1459_v1, 4 }
0x1503   :  { %1500 = vrot.lane.b32.xlu1 %v1499_v5, %s2167_s13 }
0x1507   :  { %1506 = vrot.lane.b32.xlu1 %v1505_v28, %s2168_s14 }
0x150b   :  { %v1496_v16 = vpop.permute.xlu0 %1495 }
0x150c   :  { %vm1497_vm15 = vcmp.eq.s32.totalorder %v1496_v16, 1 }
0x156e   :  { %v1518_v55 = vpop.permute.xlu1 %1517 }
0x156f   :  { %v2733_v33 = vsel %vm1514_vm14, %v1518_v55, %v2688_v53 }
0x1570   :  { %1542 = vrot.lane.b32.xlu0 %v2733_v33, %s2166_s3 }
0x1574   :  { %1523 = vrot.lane.b32.xlu0 %v1522_v6, %s2168_s14 }
0x1575   :  { %v1501_v37 = vpop.permute.xlu1 %1500 }
0x1576   :  { %v2740_v38 = vsel %vm1497_vm15, %v1501_v37, %v2694_v40  ;;  %v1684_v37 = vld [vmem:[%s2874_s1 + $0xe] sm:$0x3] }
0x1577   :  { %vm1686_vm1 = vcmp.gt.f32.partialorder %v1684_v37, 0.0 }
0x1579   :  { %v1507_v19 = vpop.permute.xlu1 %1506 }
0x157a   :  { %v1509_v22 = vsel %vm1497_vm15, %v1507_v19, %v1310_v60 }
0x157b   :  { %v1635_v34 = vrot.slane %v1509_v22, 2 }
0x15e2   :  { %v1543_v41 = vpop.permute.xlu0 %1542 }
0x15e3   :  { %v1545_v43 = vsel %vm65_vm0, %v2740_v38, %v1543_v41 }
0x15e4   :  { %1939 = vmatmul.mubr.msk.f32.vlgmr.msra.gmra.mxu0 %vm169_vm5, %v1545_v43  ;;  %vm1687_vm5 = vcmp.gt.f32.partialorder %v1685_v47, 0.0  ;;  %v2135_v43 = vld [vmem:[%s2874_s1 + $0x2] sm:$0x3] }
0x15e5   :  { %v1699_v61 = vsel %vm1687_vm5, 1, %v2165_v49 }
0x15e6   :  { %v1524_v3 = vpop.permute.xlu0 %1523 }
0x15e7   :  { %v1526_v25 = vsel %vm1514_vm14, %v1524_v3, %v2703_v7 }
0x16a4   :  { %v1615_v8 = vpop.f32.mrf.mxu0 }
0x16a5   :  { %v1622_v11 = vrot.slane %v1615_v8, 2  ;;  %v2137_v8 = vld [vmem:[%s2874_s1 + $0xc] sm:$0x3] }
0x16a6   :  { %v1617_v15 = vpop.f32.mrf.mxu0 }
0x16a7   :  { %v1624_v63 = vadd.f32 %v1622_v11, %v1620_v13  ;;  %v1626_v18 = vadd.f32 %v1625_v17, %v1617_v15  ;;  %v1737_v15 = vld [vmem:[%s2879_s6 + $0x18] sm:$0xff]  ;;  %v1735_v17 = vld [vmem:[%s2879_s6 + $0x8] sm:$0xff] }
0x16a8   :  { %1959 = vmatprep.subr.mxu1 %v1737_v15 }
0x16a9   :  { %2103 = vtanh.f32 %v1624_v63  ;;  %v1940_v0 = vmul.f32 -1.442695, %v1624_v63  ;;  %v1941_v26 = vmul.f32 -1.442695, %v1626_v18  ;;  %1960 = vmatpush3.msra.mxu1 %v1737_v15  ;;  %v1730_v63 = vld [vmem:[%s2878_s5 + $0x10] sm:$0xff] }
0x16aa   :  { %2105 = vtanh.f32 %v1626_v18 }
0x16ab   :  { %2107 = vpow2.f32 %v1940_v0  ;;  %v1728_v0 = vld [vmem:[%s2878_s5] sm:$0xff] }
0x16ac   :  { %2109 = vpow2.f32 %v1941_v26 }
0x16b6   :  { %v2104_v20 = vpop.eup %2103 }
0x16b7   :  { %v2106_v23 = vpop.eup %2105  ;;  %1641 = vrot.lane.b32.xlu1 %v2104_v20, %s2166_s3  ;;  %v1734_v20 = vld [vmem:[%s2879_s6] sm:$0xff] }
0x16b8   :  { %1669 = vrot.lane.b32.xlu0 %v2106_v23, %s2166_s3  ;;  %v2108_v45 = vpop.eup %2107 }
0x16b9   :  { %v2110_v60 = vpop.eup %2109  ;;  %v1630_v46 = vadd.f32 1.0, %v2108_v45 }
0x16ba   :  { %v1659_v4 = vadd.f32 1.0, %v2110_v60 }
0x16bb   :  { %1636 = vrot.lane.b32.xlu1 %v1635_v34, %s2166_s3  ;;  %2111 = vrcp.f32 %v1630_v46  ;;  %v1729_v34 = vld [vmem:[%s2878_s5 + $0x8] sm:$0xff] }
0x16bc   :  { %1664 = vrot.lane.b32.xlu0 %v1526_v25, %s2166_s3  ;;  %2113 = vrcp.f32 %v1659_v4 }
0x16c8   :  { %v2755_v48 = vpop.eup %2111 }
0x16c9   :  { %v2757_v30 = vpop.eup %2113 }
0x1729   :  { %v1642_v7 = vpop.permute.xlu1 %1641 }
0x172a   :  { %v1670_v57 = vpop.permute.xlu0 %1669  ;;  %v1644_v58 = vmul.f32 %v2755_v48, %v1642_v7 }
0x172b   :  { %v1672_v59 = vmul.f32 %v2757_v30, %v1670_v57 }
0x172c   :  { %1646 = vrot.lane.b32.xlu1 %v1644_v58, %s2166_s3 }
0x172d   :  { %1674 = vrot.lane.b32.xlu0 %v1672_v59, %s2166_s3  ;;  %v1637_v2 = vpop.permute.xlu1 %1636 }
0x172e   :  { %v1665_v1 = vpop.permute.xlu0 %1664  ;;  %v1639_v5 = vmul.f32 %v2755_v48, %v1637_v2 }
0x172f   :  { %v1667_v28 = vmul.f32 %v2757_v30, %v1665_v1 }
0x1730   :  { %1701 = vperm.xlu1 %1989, %v1699_v61  }
0x1731   :  { %329 = vperm.xlu0 %1990, %v2134_v62  }
0x1734   :  { %1717 = vperm.xlu1 %1989, %v1685_v47  }
0x1735   :  { %932 = vperm.xlu0 %1990, %v2506_v32  }
0x1738   :  { %1122 = vperm.xlu1 %1989, %v2596_v50   ;;  %v1688_v50 = vsel %vm1686_vm1, 1, %v2165_v49  ;;  %v2136_v49 = vld [vmem:[%s2874_s1 + $0xe] sm:$0x3] }
0x179e   :  { %v1647_v31 = vpop.permute.xlu1 %1646 }
0x179f   :  { %v1675_v55 = vpop.permute.xlu0 %1674  ;;  %v1649_v6 = vadd.f32 %v1647_v31, %v1639_v5 }
0x17a0   :  { %v1677_v16 = vadd.f32 %v1675_v55, %v1667_v28 }
0x17a1   :  { %2115 = vtanh.f32 %v1649_v6 }
0x17a2   :  { %2117 = vtanh.f32 %v1677_v16 }
0x17ab   :  { %v1702_v11 = vpop.permute.xlu1 %1701 }
0x17ac   :  { %vm1703_vm2 = vcmp.eq.s32.totalorder %v1702_v11, 1 }
0x17ae   :  { %v2116_v41 = vpop.eup %2115 }
0x17af   :  { %v2118_v32 = vpop.eup %2117  ;;  %1652 = vrot.lane.b32.xlu0 %v2116_v41, %s2166_s3  ;;  %v1718_v13 = vpop.permute.xlu1 %1717 }
0x17b0   :  { %1680 = vrot.lane.b32.xlu1 %v2118_v32, %s2166_s3 }
0x17b3   :  { %1704 = vrot.lane.b32.xlu0 %v2733_v33, %s2167_s13 }
0x17b4   :  { %1690 = vperm.xlu1 %1989, %v1688_v50  }
0x17b7   :  { %538 = vperm.xlu0 %1990, %v2135_v43  }
0x17b8   :  { %737 = vperm.xlu1 %1989, %v2483_v56   ;;  %v2138_v56 = vld [vmem:[%s2874_s1 + $0xa] sm:$0x3] }
0x17bb   :  { %925 = vperm.xlu0 %1990, %v2546_v21   ;;  %v330_v21 = vpop.permute.xlu0 %329 }
0x17bc   :  { %1133 = vperm.xlu1 %1989, %v2615_v12   ;;  %v332_v12 = vmul.f32 %v330_v21, %v2365_v35 }
0x17bf   :  { %1337 = vperm.xlu0 %1990, %v2663_v36   ;;  %v933_v36 = vpop.permute.xlu0 %932 }
0x17c0   :  { %1536 = vperm.xlu1 %1989, %v2711_v10   ;;  %v935_v10 = vmul.f32 %v933_v36, %v2560_v14  ;;  %v1731_v14 = vld [vmem:[%s2878_s5 + $0x18] sm:$0xff] }
0x17c1   :  { %1970 = vmatprep.subr.mxu0 %v1731_v14 }
0x17c2   :  { %1971 = vmatpush3.msra.mxu0 %v1731_v14 }
0x17c3   :  { %341 = vperm.xlu0 %1990, %v2136_v49   ;;  %1972 = vmatprep.subr.mxu0 %v1730_v63  ;;  %v1946_v49 = vld [vmem:[%s2880_s7] ss:$0 sm:$0xff] }
0x17c4   :  { %545 = vperm.xlu1 %1989, %v2137_v8   ;;  %1973 = vmatpush3.msra.mxu0 %v1730_v63 }
0x17c5   :  { %1974 = vmatprep.subr.mxu0 %v1729_v34 }
0x17c6   :  { %1975 = vmatpush3.msra.mxu0 %v1729_v34 }
0x17c7   :  { %744 = vperm.xlu0 %1990, %v2138_v56   ;;  %1976 = vmatprep.subr.mxu0 %v1728_v0 }
0x17c8   :  { %1330 = vperm.xlu1 %1989, %v2676_v24   ;;  %v1736_v24 = vld [vmem:[%s2879_s6 + $0x10] sm:$0xff]  ;;  %1977 = vmatpush3.msra.mxu0 %v1728_v0 }
0x17c9   :  { %1961 = vmatprep.subr.mxu1 %v1736_v24 }
0x17ca   :  { %1962 = vmatpush3.msra.mxu1 %v1736_v24 }
0x17cb   :  { %1529 = vperm.xlu0 %1990, %v2723_v52   ;;  %v1123_v52 = vpop.permute.xlu1 %1122  ;;  %1963 = vmatprep.subr.mxu1 %v1735_v17 }
0x17cc   :  { %1710 = vperm.xlu1 %1989, %v1684_v37   ;;  %1964 = vmatpush3.msra.mxu1 %v1735_v17  ;;  %v1125_v45 = vmul.f32 %v1123_v52, %v2633_v29 }
0x17cd   :  { %1965 = vmatprep.subr.mxu1 %v1734_v20 }
0x17ce   :  { %1966 = vmatpush3.msra.mxu1 %v1734_v20 }
0x17d0   :  { %334 = vrot.lane.b32.xlu1 %v332_v12, %s2167_s13 }
0x17d4   :  { %937 = vrot.lane.b32.xlu1 %v935_v10, %s2167_s13 }
0x1821   :  { %v1653_v35 = vpop.permute.xlu0 %1652 }
0x1822   :  { %v1655_v18 = vmul.f32 %v2755_v48, %v1653_v35  ;;  %v1681_v19 = vpop.permute.xlu1 %1680 }
0x1823   :  { %v1683_v23 = vmul.f32 %v2757_v30, %v1681_v19 }
0x1824   :  { %v1694_v22 = vrot.slane %v1655_v18, 6 }
0x1825   :  { %v1705_v3 = vpop.permute.xlu0 %1704 }
0x1826   :  { %v1707_v25 = vsel %vm1703_vm2, %v1683_v23, %v1705_v3  ;;  %1695 = vrot.lane.b32.xlu0 %v1694_v22, %s2167_s13 }
0x1827   :  { %v1720_v26 = vmul.f32 %v1718_v13, %v1707_v25 }
0x182a   :  { %1722 = vrot.lane.b32.xlu0 %v1720_v26, %s2167_s13 }
0x182e   :  { %1127 = vrot.lane.b32.xlu0 %v1125_v45, %s2167_s13 }
0x182f   :  { %v1691_v60 = vpop.permute.xlu1 %1690 }
0x1830   :  { %vm1692_vm4 = vcmp.eq.s32.totalorder %v1691_v60, 1 }
0x1832   :  { %v539_v46 = vpop.permute.xlu0 %538 }
0x1833   :  { %v541_v4 = vmul.f32 %v539_v46, %v2438_v54  ;;  %v738_v47 = vpop.permute.xlu1 %737 }
0x1834   :  { %v740_v48 = vmul.f32 %v738_v47, %v2498_v27 }
0x1835   :  { %542 = vst.msk [vmem:[#allocation3 + $0x2] sm:$0x3] %vm337_vm3, %v541_v4 }
0x1836   :  { %741 = vst.msk [vmem:[#allocation3 + $0x4] sm:$0x3] %vm337_vm3, %v740_v48  ;;  %v926_v7 = vpop.permute.xlu0 %925 }
0x1837   :  { %v928_v30 = vmul.f32 %v926_v7, %v2567_v42  ;;  %v1134_v57 = vpop.permute.xlu1 %1133 }
0x1838   :  { %v1136_v29 = vmul.f32 %v1134_v57, %v2641_v44 }
0x1839   :  { %929 = vst.msk [vmem:[#allocation3 + $0x6] sm:$0x3] %vm337_vm3, %v928_v30 }
0x183a   :  { %1137 = vst.msk [vmem:[#allocation4 + $0x6] sm:$0x3] %vm337_vm3, %v1136_v29  ;;  %v1338_v58 = vpop.permute.xlu0 %1337 }
0x183b   :  { %v1340_v54 = vmul.f32 %v1338_v58, %v2688_v53  ;;  %v1537_v59 = vpop.permute.xlu1 %1536 }
0x183c   :  { %v1539_v27 = vmul.f32 %v1537_v59, %v2733_v33 }
0x183d   :  { %1341 = vst.msk [vmem:[#allocation4 + $0x4] sm:$0x3] %vm337_vm3, %v1340_v54 }
0x183e   :  { %1540 = vst.msk [vmem:[#allocation4 + $0x2] sm:$0x3] %vm337_vm3, %v1539_v27  ;;  %v342_v61 = vpop.permute.xlu0 %341 }
0x183f   :  { %v344_v42 = vmul.f32 %v342_v61, %v2371_v39  ;;  %v546_v62 = vpop.permute.xlu1 %545 }
0x1840   :  { %v548_v44 = vmul.f32 %v546_v62, %v2428_v51 }
0x1841   :  { %345 = vst.msk [vmem:[#allocation4 + $0xe] sm:$0x3] %vm337_vm3, %v344_v42 }
0x1842   :  { %549 = vst.msk [vmem:[#allocation4 + $0xc] sm:$0x3] %vm337_vm3, %v548_v44  ;;  %v745_v2 = vpop.permute.xlu0 %744 }
0x1843   :  { %v747_v53 = vmul.f32 %v745_v2, %v2493_v9  ;;  %v1331_v1 = vpop.permute.xlu1 %1330 }
0x1844   :  { %v1333_v33 = vmul.f32 %v1331_v1, %v2694_v40 }
0x1845   :  { %748 = vst.msk [vmem:[#allocation4 + $0xa] sm:$0x3] %vm337_vm3, %v747_v53 }
0x1846   :  { %1334 = vst.msk [vmem:[#allocation3 + $0xa] sm:$0x3] %vm337_vm3, %v1333_v33  ;;  %v1530_v5 = vpop.permute.xlu0 %1529 }
0x1847   :  { %v1532_v39 = vmul.f32 %v1530_v5, %v2740_v38  ;;  %v1711_v28 = vpop.permute.xlu1 %1710 }
0x1849   :  { %1533 = vst.msk [vmem:[#allocation3 + $0xc] sm:$0x3] %vm337_vm3, %v1532_v39 }
0x184b   :  { %v335_v51 = vpop.permute.xlu1 %334 }
0x184c   :  { %338 = vst.msk [vmem:[#allocation3] sm:$0x3] %vm337_vm3, %v335_v51 }
0x184f   :  { %v938_v31 = vpop.permute.xlu1 %937 }
0x1850   :  { %940 = vst.msk [vmem:[#allocation4 + $0x8] sm:$0x3] %vm337_vm3, %v938_v31 }
0x1853   :  { %v1726_v9 = vld [vmem:[#allocation3] sm:$0xff] }
0x1854   :  { %1978 = vmatprep.mubr.msk.f32.mxu0 %vm65_vm0, %v1726_v9 }
0x1857   :  { %v1733_v32 = vld [vmem:[#allocation4 + $0x8] sm:$0xff] }
0x1898   :  { %v1696_v40 = vpop.permute.xlu0 %1695 }
0x1899   :  { %v1698_v55 = vsel %vm1692_vm4, %v1696_v40, %v2740_v38 }
0x189a   :  { %v1713_v6 = vmul.f32 %v1711_v28, %v1698_v55 }
0x189c   :  { %1714 = vst.msk [vmem:[#allocation3 + $0xe] sm:$0x3] %vm337_vm3, %v1713_v6  ;;  %v1723_v16 = vpop.permute.xlu0 %1722 }
0x189d   :  { %1725 = vst.msk [vmem:[#allocation4] sm:$0x3] %vm337_vm3, %v1723_v16 }
0x18a0   :  { %v1128_v37 = vpop.permute.xlu0 %1127 }
0x18a1   :  { %1130 = vst.msk [vmem:[#allocation3 + $0x8] sm:$0x3] %vm337_vm3, %v1128_v37 }
0x18a4   :  { %v1732_v41 = vld [vmem:[#allocation4] sm:$0xff] }
0x18a5   :  { %1967 = vmatprep.mubr.msk.f32.mxu1 %vm65_vm0, %v1732_v41 }
0x18a6   :  { %1968 = vmatmul.mubr.msk.f32.vlgmr.msra.gmra.mxu1 %vm65_vm0, %v1733_v32 }
0x18a8   :  { %v1727_v50 = vld [vmem:[#allocation3 + $0x8] sm:$0xff] }
0x18a9   :  { %1979 = vmatmul.mubr.msk.f32.vlgmr.msra.gmra.mxu0 %vm65_vm0, %v1727_v50 }
0x1966   :  { %v1969_v43 = vpop.f32.mrf.mxu1 }
0x1968   :  { %v1810_v56 = vpop.f32.mrf.mxu1 }
0x1969   :  { %v1980_v38 = vpop.f32.mrf.mxu0 }
0x196a   :  { %v1897_v8 = vadd.f32 %v1980_v38, %v1969_v43 }
0x196b   :  { %v1891_v21 = vpop.f32.mrf.mxu0 }
0x196c   :  { %v1908_v12 = vadd.f32 %v1946_v49, %v1897_v8  ;;  %v1892_v36 = vadd.f32 %v1891_v21, %v1810_v56 }
0x196e   :  { %1911 = vst.msk [vmem:[%s2881_s8 + $0x8] sm:$0xff] %vm1909_vm6, %v1908_v12  ;;  %v1907_v10 = vadd.f32 %v1946_v49, %v1892_v36 }
0x1970   :  { %1910 = vst.msk [vmem:[%s2881_s8] sm:$0xff] %vm1909_vm6, %v1907_v10 }
0x1971   :  { %1916 = vsyncpa [#allocation6], 1 }

</bundles_post_ra>
